<compile_context>
chip_gen: v7x
topology: tpu7x:2x2x1
jax: 0.10.0
libtpu: 0.0.40
codegen_flags: <defaults>
</compile_context>

<pallas_src>
import jax
import jax.numpy as jnp
from jax.experimental import pallas as pl
from jax.experimental.pallas import tpu as pltpu


def _add_kernel(a_ref, b_ref, o_ref):
    # Hot path: elementwise add on the VPU over the current VMEM tile.
    o_ref[...] = a_ref[...] + b_ref[...]


_FAST_PATH_BYTES = 4 << 20     # below this, XLA's fused add wins outright
_MAX_BLOCK_BYTES = 8 << 20     # 4-8 MiB blocks amortize the per-step overhead


def _round_up(x: int, m: int) -> int:
    return -(-x // m) * m


def _sublane_quantum(dtype) -> int:
    # 8 rows for 32-bit, 16 for 16-bit, 32 for 8-bit dtypes.
    return max(8, 32 // max(1, jnp.dtype(dtype).itemsize))


def _vmem_capacity_bytes() -> int:
    try:
        cap = int(getattr(pltpu.get_tpu_info(), "vmem_capacity_bytes", 0) or 0)
        if cap > 0:
            return cap
    except Exception:
        pass
    return 64 << 20            # conservative: v7x per-TensorCore VMEM


def _target_block_bytes() -> int:
    # 3 arrays (a, b, out) x 2 pipeline buffers must fit with ~25% headroom.
    budget = min((_vmem_capacity_bytes() * 3) // 4, 48 << 20)
    return max(1 << 20, min(_MAX_BLOCK_BYTES, budget // 6))


def _pallas_add_2d(a: jax.Array, b: jax.Array) -> jax.Array:
    """Tiled elementwise add on a lane-dense 2-D view."""
    M, N = a.shape
    itemsize = jnp.dtype(a.dtype).itemsize
    sub = _sublane_quantum(a.dtype)
    target = _target_block_bytes()

    # Column (lane) tile: full N when it fits the block budget at `sub` rows;
    # otherwise a large multiple of 128, so blocks stay bounded no matter how
    # wide the rows are while stores remain unmasked / lane-dense.
    if N * itemsize * sub <= target:
        tn = N
    else:
        tn = max(128, (target // (sub * itemsize)) // 128 * 128)
        if N >= 128:
            tn = min(tn, (N // 128) * 128)

    # Row (sublane) tile from the remaining block budget.
    rows_target = max(1, target // (tn * itemsize))
    tm = min(M, rows_target)
    if tm < M:
        tm = max(sub, (tm // sub) * sub)
    tm = min(tm, M)

    steps_m = pl.cdiv(M, tm)
    steps_n = pl.cdiv(N, tn)

    # Megacore-friendly grid: prefer an even number of >= 4 total steps so
    # both v7x TensorCores get >= 2 pipelined steps (shrinking tm only ever
    # reduces the VMEM footprint). Near-zero impact on single-core v5e/v6e.
    if steps_n == 1 and M >= 4 * sub:
        desired = max(4, steps_m)
        if desired % 2:
            desired += 1
        if desired != steps_m:
            tm_new = min(M, _round_up(pl.cdiv(M, desired), sub))
            tm = max(sub, min(tm, tm_new))
            steps_m = pl.cdiv(M, tm)

    block_bytes = tm * tn * itemsize
    # Actual resident footprint: 3 arrays x 2 pipeline buffers + headroom.
    vmem_limit = 6 * block_bytes + (4 << 20)

    return pl.pallas_call(
        _add_kernel,
        out_shape=jax.ShapeDtypeStruct((M, N), a.dtype),
        grid_spec=pltpu.PrefetchScalarGridSpec(
            num_scalar_prefetch=0,
            grid=(steps_m, steps_n),
            in_specs=[
                pl.BlockSpec((tm, tn), lambda i, j: (i, j)),
                pl.BlockSpec((tm, tn), lambda i, j: (i, j)),
            ],
            out_specs=pl.BlockSpec((tm, tn), lambda i, j: (i, j)),
        ),
        compiler_params=pltpu.CompilerParams(
            dimension_semantics=("parallel", "parallel"),
            vmem_limit_bytes=int(vmem_limit),
        ),
    )(a, b)


def network_forward(input1: jax.Array, input2: jax.Array) -> jax.Array:
    """Equivalent of Network.forward(input1, input2) = input1 + input2."""
    # Broadcasting / dtype-promotion cases: match torch `+` semantics via XLA.
    if input1.shape != input2.shape or input1.dtype != input2.dtype:
        return input1 + input2

    total_bytes = input1.size * jnp.dtype(input1.dtype).itemsize
    # Tiny tensors: the pallas_call prologue costs more than any tiling win.
    if total_bytes < _FAST_PATH_BYTES:
        return input1 + input2

    shape = input1.shape
    # Lane-dense requirement: minor dim must be a multiple of 128, otherwise
    # Pallas would emit masked partial stores (~50% lane utilization) and lose
    # to XLA's fused add.
    # TODO(synk): a prefix/tail split could keep the 128-divisible bulk in
    # Pallas for odd minor dims; the XLA fallback is used instead.
    if input1.ndim < 2 or shape[-1] % 128 != 0:
        return input1 + input2

    sub = _sublane_quantum(input1.dtype)
    if input1.ndim > 2:
        # Collapsing the leading dims into the sublane axis is a pure bitcast
        # under the TPU (8,128) tiled layout only when each (rows, minor)
        # slice is unpadded; otherwise skip Pallas to avoid a relayout copy
        # that would double HBM traffic.
        if shape[-2] % sub != 0:
            return input1 + input2
        a2 = input1.reshape(-1, shape[-1])
        b2 = input2.reshape(-1, shape[-1])
    else:
        a2, b2 = input1, input2

    out = _pallas_add_2d(a2, b2)
    return out.reshape(shape)


if __name__ == "__main__":
    key = jax.random.PRNGKey(0)
    ks = jax.random.split(key, 10)

    # 1) Small NCHW-like shape (the module's generic usage): 8 KiB
    #    -> XLA fast path.
    x1 = jax.random.normal(ks[0], (2, 4, 16, 16), dtype=jnp.float32)
    x2 = jax.random.normal(ks[1], (2, 4, 16, 16), dtype=jnp.float32)
    y_small = network_forward(x1, x2)
    jax.block_until_ready(y_small)
    assert jnp.allclose(y_small, x1 + x2, atol=1e-6, rtol=1e-6)

    # 2) 4 MiB f32, lane-dense (minor dim 128) -> Pallas path on an (8192, 128)
    #    bitcast view, even >= 4-step parallel grid.
    a1 = jax.random.normal(ks[2], (8, 16, 64, 128), dtype=jnp.float32)
    a2 = jax.random.normal(ks[3], (8, 16, 64, 128), dtype=jnp.float32)
    y_med = network_forward(a1, a2)
    jax.block_until_ready(y_med)
    assert jnp.allclose(y_med, a1 + a2, atol=1e-6, rtol=1e-6)

    # 3) bf16 Pallas path (sublane quantum 16).
    b1 = jax.random.normal(ks[4], (16, 16, 64, 128), dtype=jnp.bfloat16)
    b2 = jax.random.normal(ks[5], (16, 16, 64, 128), dtype=jnp.bfloat16)
    y_bf16 = network_forward(b1, b2)
    jax.block_until_ready(y_bf16)
    assert jnp.allclose(y_bf16.astype(jnp.float32),
                        (b1 + b2).astype(jnp.float32), atol=1e-2, rtol=1e-2)

    # 4) Wide 2-D rows (2 MiB per row) -> exercises the column-tiling guard;
    #    blocks stay ~8 MiB instead of blowing VMEM.
    c1 = jax.random.normal(ks[6], (8, 524288), dtype=jnp.float32)
    c2 = jax.random.normal(ks[7], (8, 524288), dtype=jnp.float32)
    y_wide = network_forward(c1, c2)
    jax.block_until_ready(y_wide)
    assert jnp.allclose(y_wide, c1 + c2, atol=1e-6, rtol=1e-6)

    # 5) Awkward shape (minor dim 65, not a multiple of 128) -> XLA fallback.
    d1 = jax.random.normal(ks[8], (7, 13, 63, 65), dtype=jnp.float32)
    d2 = jax.random.normal(ks[9], (7, 13, 63, 65), dtype=jnp.float32)
    y_odd = network_forward(d1, d2)
    jax.block_until_ready(y_odd)
    assert jnp.allclose(y_odd, d1 + d2, atol=1e-6, rtol=1e-6)

    print("KERNEL_OK")
</pallas_src>

<mosaic_0001>
module attributes {stable_mosaic.version = 11 : i64} {
  func.func @_add_kernel(%arg0: i32, %arg1: i32, %arg2: memref<2048x128xf32, #tpu.memory_space<vmem>>, %arg3: memref<2048x128xf32, #tpu.memory_space<vmem>>, %arg4: memref<2048x128xf32, #tpu.memory_space<vmem>>) attributes {dimension_semantics = [#tpu.dimension_semantics<parallel>, #tpu.dimension_semantics<parallel>], iteration_bounds = array<i64: 4, 1>, scalar_prefetch = 0 : i64, scratch_operands = 0 : i64, tpu.core_type = #tpu.core_type<tc>, window_params = [{transform_indices = @transform_0, window_bounds = array<i64: 2048, 128>}, {transform_indices = @transform_1, window_bounds = array<i64: 2048, 128>}, {transform_indices = @transform_2, window_bounds = array<i64: 2048, 128>}]} {
    %c0 = arith.constant 0 : index
    %c0_0 = arith.constant 0 : index
    %0 = vector.load %arg2[%c0, %c0_0] : memref<2048x128xf32, #tpu.memory_space<vmem>>, vector<2048x128xf32>
    %c0_1 = arith.constant 0 : index
    %c0_2 = arith.constant 0 : index
    %1 = vector.load %arg3[%c0_1, %c0_2] : memref<2048x128xf32, #tpu.memory_space<vmem>>, vector<2048x128xf32>
    %2 = arith.addf %0, %1 : vector<2048x128xf32>
    %c0_3 = arith.constant 0 : index
    %c0_4 = arith.constant 0 : index
    %3 = vector.load %arg4[%c0_3, %c0_4] : memref<2048x128xf32, #tpu.memory_space<vmem>>, vector<2048x128xf32>
    tpu.vector_store %arg4[%c0_3, %c0_4], %2 {strides = array<i32>} : memref<2048x128xf32, #tpu.memory_space<vmem>>, vector<2048x128xf32>,
    return
  }
  func.func @transform_0(%arg0: i32, %arg1: i32) -> (i32, i32) {
    %c0_i32 = arith.constant 0 : i32
    return %arg0, %arg1 : i32, i32
  }
  func.func @transform_1(%arg0: i32, %arg1: i32) -> (i32, i32) {
    %c0_i32 = arith.constant 0 : i32
    return %arg0, %arg1 : i32, i32
  }
  func.func @transform_2(%arg0: i32, %arg1: i32) -> (i32, i32) {
    %c0_i32 = arith.constant 0 : i32
    return %arg0, %arg1 : i32, i32
  }
}

</mosaic_0001>

<bundles_post_ra>
// kernel: tpu_custom_call.1
= control target key start
LH: loop header
LB: loop body
LE: loop exit
PB: predicated region body
PF: predicated region fallthrough
CT: control target
= control target key end

     0   :  { %7 = vsyncpa [#allocation3], 0  ;;  %s2646_s0 = inlined_call_operand.hbm [shape: f32[8192,128], index: 0, kind: input, shape index: {}]   ;;  %s2647_s1 = inlined_call_operand.hbm [shape: f32[8192,128], index: 1, kind: input, shape index: {}]   ;;  %s2648_s2 = inlined_call_operand.hbm [shape: f32[8192,128], index: 2, kind: output, shape index: {}]  }
   0x1   :  { %9 = vsyncpa [#allocation3 + $0x1], 0 }
   0x2   :  { %10 = vsyncpa [#allocation6], 0 }
   0x3   :  { %12 = vsyncpa [#allocation6 + $0x1], 0 }
   0x4   :  { %13 = vsyncpa [#allocation4], 0 }
   0x5   :  { %15 = vsyncpa [#allocation4 + $0x1], 0  ;;  %s1637_s9 = smov 0   ;;  %s1639_s10 = smov 0  }
   0x6   :  { %s1641_s11 = smov 0   ;;  %s1643_s12 = smov 0  }
   0x7   :  { %s1645_s13 = smov 0   ;;  %s1647_s14 = smov 0  }
   0x8 LB: > { %s1374_s15 = sadd.s32 4294967295, %s1613_s14   ;;  %s1375_s16 = sadd.s32 4294967294, %s1613_s14   ;;  %s1613_s14 = sphi %s1647_s14, %s21_s14   ;;  %s1609_s13 = sphi %s1645_s13, %s2665_s13   ;;  %s1605_s12 = sphi %s1643_s12, %s2664_s12   ;;  %s1601_s11 = sphi %s1641_s11, %s2663_s11   ;;  %s1597_s10 = sphi %s1639_s10, %s2662_s10   ;;  %s1593_s9 = sphi %s1637_s9, %s2661_s9  }
   0x9   : > { %s33_s17 = sadd.s32 1, %s1609_s13  ;;  %s42_s18 = sadd.s32 1, %s1601_s11 }
   0xa   : > { %p35_p0 = scmp.ge.s32.totalorder %s33_s17, 4  ;;  %p49_p1 = scmp.ne.s32.totalorder %s1601_s11, %s1597_s10 }
   0xb   : > { %p50_p2 = scmp.eq.s32.totalorder %s1613_s14, 0  ;;  %p55_p3 = scmp.ne.s32.totalorder %s1597_s10, %s1593_s9 }
   0xc   : > { %s2667_s17 = smov (%p35_p0, %s33_s17), 0  ;;  %p56_p5 = scmp.eq.s32.totalorder %s1374_s15, 0 }
   0xd   : > { %p1678_p4 = por %p50_p2, %p49_p1  ;;  %s37_s20 = ssub.s32 %s1609_s13, %s2667_s17 }
   0xe   : > { %p109_p6 = scmp.eq.s32.totalorder %s1374_s15, 3  ;;  %p40_p7 = scmp.eq.s32.totalorder %s37_s20, 0 }
   0xf   : > { %p1684_p8 = por %p56_p5, %p55_p3  ;;  %p115_p10 = scmp.eq.s32.totalorder %s1375_s16, 3 }
  0x10   : > { %p1688_p9 = por %p109_p6, %p49_p1  ;;  %p1413_p12 = scmp.lt.s32.totalorder %s1613_s14, 4 }
  0x11   : > { %s2652_s21 = scalar_select %p1684_p8, 1, 0 }
  0x12   : > { %s2653_s22 = scalar_select %p1688_p9, 1, 0 }
  0x13   : > { %s1693_s23 = scalar_select %p40_p7, %s1601_s11, %s42_s18  }
  0x14   : > { %p1695_p11 = por %p115_p10, %p55_p3  ;;  %s1701_s25 = sand.u32 1, %s1601_s11  }
  0x15   : > { %s1378_s26 = sshll.u32 %s1701_s25, 11  ;;  %s1393_s27 = sshll.u32 %s1609_s13, 15 }
  0x16   : > { %s2654_s24 = scalar_select %p1695_p11, 1, 0 }
  0x17   : > { %s1710_s30 = scalar_lea.hbm %s2646_s0, %s1393_s27  ;;  %s139_s3 = scalar_lea.vmem [#allocation2], %s1378_s26 }
  0x18   : > { %s147_s4 = sshll.u32 %s139_s3, 4  ;;  %p1718_p13 = pnand %p1413_p12, %p1678_p4  ;;  %s1714_s4 = int_to_ptr.vmem [resolvable:$true] %s147_s4 }
  0x19   : > { %s136_s6 = scalar_lea.sflag [#allocation3], %s1701_s25  ;;  %s1467_s7 = scalar_lea.hbm %s1710_s30, 32768 }
  0x1a   : > { %p1468_p1 = scmp.ne.s32.totalorder %s1710_s30, %s1467_s7  ;;  %p1469_p2 = pneg %p1718_p13 }
  0x1b   : > { %s1472_s16 = scalar_lea.hbm %s2646_s0, 131072  ;;  %p1473_p4 = scmp.lt.u32.totalorder %s1710_s30, %s2646_s0 }
  0x1c   : > { %p1470_p3 = pnand %p1469_p2, %p1468_p1  ;;  %p1474_p6 = scmp.lt.u32.totalorder %s1472_s16, %s1467_s7 }
  0x1d   : > { %p1476_p10 = scmp.lt.u32.totalorder %s1467_s7, %s1710_s30 }
  0x1e   : > { %p1471_p5 = pneg %p1470_p3  ;;  %p1475_p7 = por %p1474_p6, %p1473_p4 }
  0x20   : > { %p1477_p12 = por %p1476_p10, %p1475_p7 }
  0x22   : > { %p1478_p0 = pnand %p1477_p12, %p1471_p5 }
  0x24   : > { %1481 = shalt.err (!%p1478_p0)
}
  0x25   : > { %s1482_s20 = scalar_lea.vmem %s1714_s4, 32768  ;;  %s1615_s28 = smov [#allocation2]  }
  0x26   : > { %p1483_p1 = scmp.ne.s32.totalorder %s1714_s4, %s1482_s20  ;;  %s1487_s29 = sshll.u32 %s1615_s28, 4  ;;  %s1488_s29 = int_to_ptr.vmem [resolvable:$false] %s1487_s29 }
  0x27   : > { %s1489_s3 = scalar_lea.vmem %s1488_s29, 65536  ;;  %p1490_p9 = scmp.lt.s32.totalorder %s1714_s4, %s1488_s29 }
  0x28   : > { %p1485_p3 = pnand %p1483_p1, %p1469_p2  ;;  %p1491_p4 = scmp.lt.s32.totalorder %s1489_s3, %s1482_s20 }
  0x2a   : > { %p1486_p11 = pneg %p1485_p3  ;;  %p1492_p6 = por %p1491_p4, %p1490_p9 }
  0x2c   : > { %p1493_p7 = pnand %p1492_p6, %p1486_p11 }
  0x2e   : > { %1496 = shalt.err (!%p1493_p7)
}
  0x2f   : > { %s1616_s7 = smov 128   ;;  %s1617_s8 = smov 8  }
  0x30   : > { %1405 = dma.hbm_to_vmem [thread:$0]  (!%p1718_p13), %s1710_s30, 32768, %s1714_s4, %s136_s6, %s1616_s7, %s1616_s7, %s1617_s8  }
  0x31   : > { %p177_p9 = scmp.lt.s32.totalorder %s1613_s14, 5  ;;  %s1760_s18 = scalar_lea.hbm %s2647_s1, %s1393_s27 }
  0x32   : > { %p2656_p11 = scmp.ge.s32.totalorder %s1613_s14, 1  ;;  %s161_s20 = scalar_lea.vmem [#allocation5], %s1378_s26 }
  0x33   : > { %s169_s28 = sshll.u32 %s161_s20, 4  ;;  %s158_s30 = scalar_lea.sflag [#allocation6], %s1701_s25  ;;  %s1770_s28 = int_to_ptr.vmem [resolvable:$true] %s169_s28 }
  0x34   : > { %p1764_p0 = pnand %p2656_p11, %p177_p9  ;;  %s1497_s4 = scalar_lea.hbm %s1760_s18, 32768 }
  0x35   : > { %p1498_p5 = scmp.ne.s32.totalorder %s1760_s18, %s1497_s4  ;;  %s1502_s29 = scalar_lea.hbm %s2647_s1, 131072 }
  0x36   : > { %p1503_p1 = scmp.lt.u32.totalorder %s1760_s18, %s2647_s1  ;;  %p1504_p3 = scmp.lt.u32.totalorder %s1502_s29, %s1497_s4 }
  0x37   : > { %p1500_p10 = pnand %p1498_p5, %p1469_p2  ;;  %p1506_p6 = scmp.lt.u32.totalorder %s1497_s4, %s1760_s18 }
  0x38   : > { %p1505_p4 = por %p1504_p3, %p1503_p1 }
  0x39   : > { %p1501_p12 = pneg %p1500_p10 }
  0x3a   : > { %p1507_p7 = por %p1506_p6, %p1505_p4 }
  0x3c   : > { %p1508_p9 = pnand %p1507_p7, %p1501_p12 }
  0x3e   : > { %1511 = shalt.err (!%p1508_p9)
}
  0x3f   : > { %s1512_s26 = scalar_lea.vmem %s1770_s28, 32768  ;;  %s1618_s16 = smov [#allocation5]  }
  0x40   : > { %p1513_p11 = scmp.ne.s32.totalorder %s1770_s28, %s1512_s26  ;;  %s1517_s20 = sshll.u32 %s1618_s16, 4  ;;  %s1518_s20 = int_to_ptr.vmem [resolvable:$false] %s1517_s20 }
  0x41   : > { %s1519_s27 = scalar_lea.vmem %s1518_s20, 65536  ;;  %p1520_p8 = scmp.lt.s32.totalorder %s1770_s28, %s1518_s20 }
  0x42   : > { %p1515_p5 = pnand %p1513_p11, %p1469_p2  ;;  %p1521_p1 = scmp.lt.s32.totalorder %s1519_s27, %s1512_s26 }
  0x44   : > { %p1516_p10 = pneg %p1515_p5  ;;  %p1522_p3 = por %p1521_p1, %p1520_p8 }
  0x46   : > { %p1523_p4 = pnand %p1522_p3, %p1516_p10 }
  0x48   : > { %1526 = shalt.err (!%p1523_p4)
}
  0x49   : > { %1408 = dma.hbm_to_vmem [thread:$0]  (!%p1718_p13), %s1760_s18, 32768, %s1770_s28, %s158_s30, %s1616_s7, %s1616_s7, %s1617_s8  }
  0x4a   : > { %181 = sbr.rel (%p1764_p0) target bundleno = 301 (0x12d), region = 28  ;;  %s1804_s4 = sand.u32 (!%p1764_p0), 1, %s1597_s10  }
  0x4b   : > { %s1385_s6 = sshll.u32 (!%p1764_p0), %s1804_s4, 11  ;;  %s184_s29 = scalar_lea.sflag (!%p1764_p0), [#allocation3], %s1804_s4 }
  0x4c   : > { %s1808_s5 = scalar_lea.vmem (!%p1764_p0), [#allocation2], %s1385_s6  ;;  %p2658_p8 = scmp.ne.s32.totalorder (!%p1764_p0), %s2652_s21, 0 }
  0x51   : > { %1580 = dma.done.wait (%p2658_p8), %s184_s29, 32768  }
  0x52   : > { %1582 = vsyncadd (%p2658_p8), %s184_s29, 4294934528  ;;  %s193_s25 = scalar_lea.sflag [#allocation6], %s1804_s4  ;;  %s1815_s7 = scalar_lea.vmem [#allocation5], %s1385_s6 }
  0x53   : > { %1584 = dma.done.wait (%p2658_p8), %s193_s25, 32768  }
  0x54   : > { %1586 = vsyncadd (%p2658_p8), %s193_s25, 4294934528  ;;  %v225_v0 = vld [vmem:[%s1808_s5] sm:$0xff]  ;;  %v226_v2 = vld [vmem:[%s1808_s5 + $0x8] sm:$0xff]  ;;  %s1830_s21 = scalar_lea.vmem [#allocation7], %s1385_s6  ;;  %s1395_s8 = sshll.u32 %s1605_s12, 15 }
  0x55   : > { %v481_v1 = vld [vmem:[%s1815_s7] sm:$0xff]  ;;  %v482_v4 = vld [vmem:[%s1815_s7 + $0x8] sm:$0xff]  ;;  %v227_v5 = vld [vmem:[%s1808_s5 + $0x10] sm:$0xff]  ;;  %s1264_s18 = sshll.u32 %s1830_s21, 4  ;;  %s2592_s28 = scalar_lea.hbm %s2648_s2, %s1395_s8  ;;  %s2594_s18 = int_to_ptr.vmem [resolvable:$true] %s1264_s18 }
  0x56   : > { %v737_v3 = vadd.f32 %v481_v1, %v225_v0  ;;  %v483_v6 = vld [vmem:[%s1815_s7 + $0x10] sm:$0xff]  ;;  %v738_v7 = vadd.f32 %v482_v4, %v226_v2  ;;  %v228_v9 = vld [vmem:[%s1808_s5 + $0x18] sm:$0xff]  ;;  %v229_v11 = vld [vmem:[%s1808_s5 + $0x20] sm:$0xff]  ;;  %s1250_s30 = scalar_lea.sflag [#allocation4], %s1804_s4  ;;  %s1527_s3 = scalar_lea.vmem %s2594_s18, 32768 }
  0x57   : > { %v739_v8 = vadd.f32 %v483_v6, %v227_v5  ;;  %v484_v10 = vld [vmem:[%s1815_s7 + $0x18] sm:$0xff]  ;;  %v485_v13 = vld [vmem:[%s1815_s7 + $0x20] sm:$0xff]  ;;  %v230_v14 = vld [vmem:[%s1808_s5 + $0x28] sm:$0xff]  ;;  %p1528_p13 = scmp.ne.s32.totalorder %s2594_s18, %s1527_s3  ;;  %p2659_p2 = scmp.ne.s32.totalorder %s2653_s22, 0 }
  0x58   : > { %993 = vst [vmem:[%s1830_s21] sm:$0xff] %v737_v3  ;;  %v740_v12 = vadd.f32 %v484_v10, %v228_v9  ;;  %v486_v15 = vld [vmem:[%s1815_s7 + $0x28] sm:$0xff]  ;;  %994 = vst [vmem:[%s1830_s21 + $0x8] sm:$0xff] %v738_v7  ;;  %v741_v16 = vadd.f32 %v485_v13, %v229_v11  ;;  %v231_v18 = vld [vmem:[%s1808_s5 + $0x30] sm:$0xff]  ;;  %s1619_s15 = smov [#allocation7]  }
  0x59   : > { %995 = vst [vmem:[%s1830_s21 + $0x10] sm:$0xff] %v739_v8  ;;  %v742_v17 = vadd.f32 %v486_v15, %v230_v14  ;;  %v487_v19 = vld [vmem:[%s1815_s7 + $0x30] sm:$0xff]  ;;  %v232_v20 = vld [vmem:[%s1808_s5 + $0x38] sm:$0xff]  ;;  %v233_v23 = vld [vmem:[%s1808_s5 + $0x40] sm:$0xff]  ;;  %p1529_p0 = pnand %p1528_p13, %p2659_p2  ;;  %s1531_s26 = sshll.u32 %s1619_s15, 4  ;;  %s1532_s26 = int_to_ptr.vmem [resolvable:$false] %s1531_s26 }
  0x5a   : > { %996 = vst [vmem:[%s1830_s21 + $0x18] sm:$0xff] %v740_v12  ;;  %v743_v21 = vadd.f32 %v487_v19, %v231_v18  ;;  %v488_v22 = vld [vmem:[%s1815_s7 + $0x38] sm:$0xff]  ;;  %v489_v24 = vld [vmem:[%s1815_s7 + $0x40] sm:$0xff]  ;;  %997 = vst [vmem:[%s1830_s21 + $0x20] sm:$0xff] %v741_v16  ;;  %s1533_s16 = scalar_lea.vmem %s1532_s26, 65536  ;;  %p1534_p6 = scmp.lt.s32.totalorder %s2594_s18, %s1532_s26 }
  0x5b   : > { %998 = vst [vmem:[%s1830_s21 + $0x28] sm:$0xff] %v742_v17  ;;  %v744_v25 = vadd.f32 %v488_v22, %v232_v20  ;;  %v745_v26 = vadd.f32 %v489_v24, %v233_v23  ;;  %v234_v27 = vld [vmem:[%s1808_s5 + $0x48] sm:$0xff]  ;;  %v235_v29 = vld [vmem:[%s1808_s5 + $0x50] sm:$0xff]  ;;  %v236_v32 = vld [vmem:[%s1808_s5 + $0x58] sm:$0xff]  ;;  %p1530_p12 = pneg %p1529_p0  ;;  %p1535_p7 = scmp.lt.s32.totalorder %s1533_s16, %s1527_s3 }
  0x5c   : > { %v490_v28 = vld [vmem:[%s1815_s7 + $0x48] sm:$0xff]  ;;  %999 = vst [vmem:[%s1830_s21 + $0x30] sm:$0xff] %v743_v21  ;;  %v491_v31 = vld [vmem:[%s1815_s7 + $0x50] sm:$0xff]  ;;  %v492_v33 = vld [vmem:[%s1815_s7 + $0x58] sm:$0xff] }
  0x5d   : > { %v746_v30 = vadd.f32 %v490_v28, %v234_v27  ;;  %1000 = vst [vmem:[%s1830_s21 + $0x38] sm:$0xff] %v744_v25  ;;  %1001 = vst [vmem:[%s1830_s21 + $0x40] sm:$0xff] %v745_v26  ;;  %v747_v34 = vadd.f32 %v491_v31, %v235_v29  ;;  %v748_v35 = vadd.f32 %v492_v33, %v236_v32  ;;  %v237_v36 = vld [vmem:[%s1808_s5 + $0x60] sm:$0xff]  ;;  %v238_v38 = vld [vmem:[%s1808_s5 + $0x68] sm:$0xff]  ;;  %p1536_p9 = por %p1535_p7, %p1534_p6 }
  0x5e   : > { %v493_v37 = vld [vmem:[%s1815_s7 + $0x60] sm:$0xff]  ;;  %v494_v40 = vld [vmem:[%s1815_s7 + $0x68] sm:$0xff]  ;;  %v239_v41 = vld [vmem:[%s1808_s5 + $0x70] sm:$0xff] }
  0x5f   : > { %1002 = vst [vmem:[%s1830_s21 + $0x48] sm:$0xff] %v746_v30  ;;  %v749_v39 = vadd.f32 %v493_v37, %v237_v36  ;;  %v495_v42 = vld [vmem:[%s1815_s7 + $0x70] sm:$0xff]  ;;  %1003 = vst [vmem:[%s1830_s21 + $0x50] sm:$0xff] %v747_v34  ;;  %v750_v43 = vadd.f32 %v494_v40, %v238_v38  ;;  %v240_v45 = vld [vmem:[%s1808_s5 + $0x78] sm:$0xff]  ;;  %p1537_p11 = pnand %p1536_p9, %p1530_p12 }
  0x60   : > { %1004 = vst [vmem:[%s1830_s21 + $0x58] sm:$0xff] %v748_v35  ;;  %v751_v44 = vadd.f32 %v495_v42, %v239_v41  ;;  %v496_v46 = vld [vmem:[%s1815_s7 + $0x78] sm:$0xff]  ;;  %v241_v47 = vld [vmem:[%s1808_s5 + $0x80] sm:$0xff]  ;;  %v242_v50 = vld [vmem:[%s1808_s5 + $0x88] sm:$0xff] }
  0x61   : > { %1005 = vst [vmem:[%s1830_s21 + $0x60] sm:$0xff] %v749_v39  ;;  %v752_v48 = vadd.f32 %v496_v46, %v240_v45  ;;  %v497_v49 = vld [vmem:[%s1815_s7 + $0x80] sm:$0xff]  ;;  %v498_v51 = vld [vmem:[%s1815_s7 + $0x88] sm:$0xff]  ;;  %1006 = vst [vmem:[%s1830_s21 + $0x68] sm:$0xff] %v750_v43 }
  0x62   : > { %1007 = vst [vmem:[%s1830_s21 + $0x70] sm:$0xff] %v751_v44  ;;  %v753_v52 = vadd.f32 %v497_v49, %v241_v47  ;;  %v754_v53 = vadd.f32 %v498_v51, %v242_v50  ;;  %v243_v54 = vld [vmem:[%s1808_s5 + $0x90] sm:$0xff]  ;;  %v244_v56 = vld [vmem:[%s1808_s5 + $0x98] sm:$0xff]  ;;  %v245_v59 = vld [vmem:[%s1808_s5 + $0xa0] sm:$0xff] }
  0x63   : > { %v499_v55 = vld [vmem:[%s1815_s7 + $0x90] sm:$0xff]  ;;  %1008 = vst [vmem:[%s1830_s21 + $0x78] sm:$0xff] %v752_v48  ;;  %v500_v58 = vld [vmem:[%s1815_s7 + $0x98] sm:$0xff]  ;;  %v501_v60 = vld [vmem:[%s1815_s7 + $0xa0] sm:$0xff] }
  0x64   : > { %v755_v57 = vadd.f32 %v499_v55, %v243_v54  ;;  %1009 = vst [vmem:[%s1830_s21 + $0x80] sm:$0xff] %v753_v52  ;;  %1010 = vst [vmem:[%s1830_s21 + $0x88] sm:$0xff] %v754_v53  ;;  %v756_v61 = vadd.f32 %v500_v58, %v244_v56  ;;  %v757_v62 = vadd.f32 %v501_v60, %v245_v59  ;;  %v246_v63 = vld [vmem:[%s1808_s5 + $0xa8] sm:$0xff]  ;;  %v247_v1 = vld [vmem:[%s1808_s5 + $0xb0] sm:$0xff] }
  0x65   : > { %v502_v0 = vld [vmem:[%s1815_s7 + $0xa8] sm:$0xff]  ;;  %v503_v3 = vld [vmem:[%s1815_s7 + $0xb0] sm:$0xff]  ;;  %v248_v4 = vld [vmem:[%s1808_s5 + $0xb8] sm:$0xff] }
  0x66   : > { %1011 = vst [vmem:[%s1830_s21 + $0x90] sm:$0xff] %v755_v57  ;;  %v758_v2 = vadd.f32 %v502_v0, %v246_v63  ;;  %v504_v5 = vld [vmem:[%s1815_s7 + $0xb8] sm:$0xff]  ;;  %1012 = vst [vmem:[%s1830_s21 + $0x98] sm:$0xff] %v756_v61  ;;  %v759_v6 = vadd.f32 %v503_v3, %v247_v1  ;;  %v249_v8 = vld [vmem:[%s1808_s5 + $0xc0] sm:$0xff] }
  0x67   : > { %1013 = vst [vmem:[%s1830_s21 + $0xa0] sm:$0xff] %v757_v62  ;;  %v760_v7 = vadd.f32 %v504_v5, %v248_v4  ;;  %v505_v9 = vld [vmem:[%s1815_s7 + $0xc0] sm:$0xff]  ;;  %v250_v10 = vld [vmem:[%s1808_s5 + $0xc8] sm:$0xff]  ;;  %v251_v13 = vld [vmem:[%s1808_s5 + $0xd0] sm:$0xff] }
  0x68   : > { %1014 = vst [vmem:[%s1830_s21 + $0xa8] sm:$0xff] %v758_v2  ;;  %v761_v11 = vadd.f32 %v505_v9, %v249_v8  ;;  %v506_v12 = vld [vmem:[%s1815_s7 + $0xc8] sm:$0xff]  ;;  %v507_v14 = vld [vmem:[%s1815_s7 + $0xd0] sm:$0xff]  ;;  %1015 = vst [vmem:[%s1830_s21 + $0xb0] sm:$0xff] %v759_v6 }
  0x69   : > { %1016 = vst [vmem:[%s1830_s21 + $0xb8] sm:$0xff] %v760_v7  ;;  %v762_v15 = vadd.f32 %v506_v12, %v250_v10  ;;  %v763_v16 = vadd.f32 %v507_v14, %v251_v13  ;;  %v252_v17 = vld [vmem:[%s1808_s5 + $0xd8] sm:$0xff]  ;;  %v253_v19 = vld [vmem:[%s1808_s5 + $0xe0] sm:$0xff]  ;;  %v254_v22 = vld [vmem:[%s1808_s5 + $0xe8] sm:$0xff] }
  0x6a   : > { %v508_v18 = vld [vmem:[%s1815_s7 + $0xd8] sm:$0xff]  ;;  %1017 = vst [vmem:[%s1830_s21 + $0xc0] sm:$0xff] %v761_v11  ;;  %v509_v21 = vld [vmem:[%s1815_s7 + $0xe0] sm:$0xff]  ;;  %v510_v23 = vld [vmem:[%s1815_s7 + $0xe8] sm:$0xff] }
  0x6b   : > { %v764_v20 = vadd.f32 %v508_v18, %v252_v17  ;;  %1018 = vst [vmem:[%s1830_s21 + $0xc8] sm:$0xff] %v762_v15  ;;  %1019 = vst [vmem:[%s1830_s21 + $0xd0] sm:$0xff] %v763_v16  ;;  %v765_v24 = vadd.f32 %v509_v21, %v253_v19  ;;  %v766_v25 = vadd.f32 %v510_v23, %v254_v22  ;;  %v255_v26 = vld [vmem:[%s1808_s5 + $0xf0] sm:$0xff]  ;;  %v256_v28 = vld [vmem:[%s1808_s5 + $0xf8] sm:$0xff] }
  0x6c   : > { %v511_v27 = vld [vmem:[%s1815_s7 + $0xf0] sm:$0xff]  ;;  %v512_v30 = vld [vmem:[%s1815_s7 + $0xf8] sm:$0xff]  ;;  %v257_v31 = vld [vmem:[%s1808_s5 + $0x100] sm:$0xff] }
  0x6d   : > { %1020 = vst [vmem:[%s1830_s21 + $0xd8] sm:$0xff] %v764_v20  ;;  %v767_v29 = vadd.f32 %v511_v27, %v255_v26  ;;  %v513_v32 = vld [vmem:[%s1815_s7 + $0x100] sm:$0xff]  ;;  %1021 = vst [vmem:[%s1830_s21 + $0xe0] sm:$0xff] %v765_v24  ;;  %v768_v33 = vadd.f32 %v512_v30, %v256_v28  ;;  %v258_v35 = vld [vmem:[%s1808_s5 + $0x108] sm:$0xff] }
  0x6e   : > { %1022 = vst [vmem:[%s1830_s21 + $0xe8] sm:$0xff] %v766_v25  ;;  %v769_v34 = vadd.f32 %v513_v32, %v257_v31  ;;  %v514_v36 = vld [vmem:[%s1815_s7 + $0x108] sm:$0xff]  ;;  %v259_v37 = vld [vmem:[%s1808_s5 + $0x110] sm:$0xff]  ;;  %v260_v40 = vld [vmem:[%s1808_s5 + $0x118] sm:$0xff] }
  0x6f   : > { %1023 = vst [vmem:[%s1830_s21 + $0xf0] sm:$0xff] %v767_v29  ;;  %v770_v38 = vadd.f32 %v514_v36, %v258_v35  ;;  %v515_v39 = vld [vmem:[%s1815_s7 + $0x110] sm:$0xff]  ;;  %v516_v41 = vld [vmem:[%s1815_s7 + $0x118] sm:$0xff]  ;;  %1024 = vst [vmem:[%s1830_s21 + $0xf8] sm:$0xff] %v768_v33 }
  0x70   : > { %1025 = vst [vmem:[%s1830_s21 + $0x100] sm:$0xff] %v769_v34  ;;  %v771_v42 = vadd.f32 %v515_v39, %v259_v37  ;;  %v772_v43 = vadd.f32 %v516_v41, %v260_v40  ;;  %v261_v44 = vld [vmem:[%s1808_s5 + $0x120] sm:$0xff]  ;;  %v262_v46 = vld [vmem:[%s1808_s5 + $0x128] sm:$0xff]  ;;  %v263_v49 = vld [vmem:[%s1808_s5 + $0x130] sm:$0xff] }
  0x71   : > { %v517_v45 = vld [vmem:[%s1815_s7 + $0x120] sm:$0xff]  ;;  %1026 = vst [vmem:[%s1830_s21 + $0x108] sm:$0xff] %v770_v38  ;;  %v518_v48 = vld [vmem:[%s1815_s7 + $0x128] sm:$0xff]  ;;  %v519_v50 = vld [vmem:[%s1815_s7 + $0x130] sm:$0xff] }
  0x72   : > { %v773_v47 = vadd.f32 %v517_v45, %v261_v44  ;;  %1027 = vst [vmem:[%s1830_s21 + $0x110] sm:$0xff] %v771_v42  ;;  %1028 = vst [vmem:[%s1830_s21 + $0x118] sm:$0xff] %v772_v43  ;;  %v774_v51 = vadd.f32 %v518_v48, %v262_v46  ;;  %v775_v52 = vadd.f32 %v519_v50, %v263_v49  ;;  %v264_v53 = vld [vmem:[%s1808_s5 + $0x138] sm:$0xff]  ;;  %v265_v55 = vld [vmem:[%s1808_s5 + $0x140] sm:$0xff] }
  0x73   : > { %v520_v54 = vld [vmem:[%s1815_s7 + $0x138] sm:$0xff]  ;;  %v521_v57 = vld [vmem:[%s1815_s7 + $0x140] sm:$0xff]  ;;  %v266_v58 = vld [vmem:[%s1808_s5 + $0x148] sm:$0xff] }
  0x74   : > { %1029 = vst [vmem:[%s1830_s21 + $0x120] sm:$0xff] %v773_v47  ;;  %v776_v56 = vadd.f32 %v520_v54, %v264_v53  ;;  %v522_v59 = vld [vmem:[%s1815_s7 + $0x148] sm:$0xff]  ;;  %1030 = vst [vmem:[%s1830_s21 + $0x128] sm:$0xff] %v774_v51  ;;  %v777_v60 = vadd.f32 %v521_v57, %v265_v55  ;;  %v267_v62 = vld [vmem:[%s1808_s5 + $0x150] sm:$0xff] }
  0x75   : > { %1031 = vst [vmem:[%s1830_s21 + $0x130] sm:$0xff] %v775_v52  ;;  %v778_v61 = vadd.f32 %v522_v59, %v266_v58  ;;  %v523_v63 = vld [vmem:[%s1815_s7 + $0x150] sm:$0xff]  ;;  %v268_v0 = vld [vmem:[%s1808_s5 + $0x158] sm:$0xff]  ;;  %v269_v3 = vld [vmem:[%s1808_s5 + $0x160] sm:$0xff] }
  0x76   : > { %1032 = vst [vmem:[%s1830_s21 + $0x138] sm:$0xff] %v776_v56  ;;  %v779_v1 = vadd.f32 %v523_v63, %v267_v62  ;;  %v524_v2 = vld [vmem:[%s1815_s7 + $0x158] sm:$0xff]  ;;  %v525_v4 = vld [vmem:[%s1815_s7 + $0x160] sm:$0xff]  ;;  %1033 = vst [vmem:[%s1830_s21 + $0x140] sm:$0xff] %v777_v60 }
  0x77   : > { %1034 = vst [vmem:[%s1830_s21 + $0x148] sm:$0xff] %v778_v61  ;;  %v780_v5 = vadd.f32 %v524_v2, %v268_v0  ;;  %v781_v6 = vadd.f32 %v525_v4, %v269_v3  ;;  %v270_v7 = vld [vmem:[%s1808_s5 + $0x168] sm:$0xff]  ;;  %v271_v9 = vld [vmem:[%s1808_s5 + $0x170] sm:$0xff]  ;;  %v272_v12 = vld [vmem:[%s1808_s5 + $0x178] sm:$0xff] }
  0x78   : > { %v526_v8 = vld [vmem:[%s1815_s7 + $0x168] sm:$0xff]  ;;  %1035 = vst [vmem:[%s1830_s21 + $0x150] sm:$0xff] %v779_v1  ;;  %v527_v11 = vld [vmem:[%s1815_s7 + $0x170] sm:$0xff]  ;;  %v528_v13 = vld [vmem:[%s1815_s7 + $0x178] sm:$0xff] }
  0x79   : > { %v782_v10 = vadd.f32 %v526_v8, %v270_v7  ;;  %1036 = vst [vmem:[%s1830_s21 + $0x158] sm:$0xff] %v780_v5  ;;  %1037 = vst [vmem:[%s1830_s21 + $0x160] sm:$0xff] %v781_v6  ;;  %v783_v14 = vadd.f32 %v527_v11, %v271_v9  ;;  %v784_v15 = vadd.f32 %v528_v13, %v272_v12  ;;  %v273_v16 = vld [vmem:[%s1808_s5 + $0x180] sm:$0xff]  ;;  %v274_v18 = vld [vmem:[%s1808_s5 + $0x188] sm:$0xff] }
  0x7a   : > { %v529_v17 = vld [vmem:[%s1815_s7 + $0x180] sm:$0xff]  ;;  %v530_v20 = vld [vmem:[%s1815_s7 + $0x188] sm:$0xff]  ;;  %v275_v21 = vld [vmem:[%s1808_s5 + $0x190] sm:$0xff] }
  0x7b   : > { %1038 = vst [vmem:[%s1830_s21 + $0x168] sm:$0xff] %v782_v10  ;;  %v785_v19 = vadd.f32 %v529_v17, %v273_v16  ;;  %v531_v22 = vld [vmem:[%s1815_s7 + $0x190] sm:$0xff]  ;;  %1039 = vst [vmem:[%s1830_s21 + $0x170] sm:$0xff] %v783_v14  ;;  %v786_v23 = vadd.f32 %v530_v20, %v274_v18  ;;  %v276_v25 = vld [vmem:[%s1808_s5 + $0x198] sm:$0xff] }
  0x7c   : > { %1040 = vst [vmem:[%s1830_s21 + $0x178] sm:$0xff] %v784_v15  ;;  %v787_v24 = vadd.f32 %v531_v22, %v275_v21  ;;  %v532_v26 = vld [vmem:[%s1815_s7 + $0x198] sm:$0xff]  ;;  %v277_v27 = vld [vmem:[%s1808_s5 + $0x1a0] sm:$0xff]  ;;  %v278_v30 = vld [vmem:[%s1808_s5 + $0x1a8] sm:$0xff] }
  0x7d   : > { %1041 = vst [vmem:[%s1830_s21 + $0x180] sm:$0xff] %v785_v19  ;;  %v788_v28 = vadd.f32 %v532_v26, %v276_v25  ;;  %v533_v29 = vld [vmem:[%s1815_s7 + $0x1a0] sm:$0xff]  ;;  %v534_v31 = vld [vmem:[%s1815_s7 + $0x1a8] sm:$0xff]  ;;  %1042 = vst [vmem:[%s1830_s21 + $0x188] sm:$0xff] %v786_v23 }
  0x7e   : > { %1043 = vst [vmem:[%s1830_s21 + $0x190] sm:$0xff] %v787_v24  ;;  %v789_v32 = vadd.f32 %v533_v29, %v277_v27  ;;  %v790_v33 = vadd.f32 %v534_v31, %v278_v30  ;;  %v279_v34 = vld [vmem:[%s1808_s5 + $0x1b0] sm:$0xff]  ;;  %v280_v36 = vld [vmem:[%s1808_s5 + $0x1b8] sm:$0xff]  ;;  %v281_v39 = vld [vmem:[%s1808_s5 + $0x1c0] sm:$0xff] }
  0x7f   : > { %v535_v35 = vld [vmem:[%s1815_s7 + $0x1b0] sm:$0xff]  ;;  %1044 = vst [vmem:[%s1830_s21 + $0x198] sm:$0xff] %v788_v28  ;;  %v536_v38 = vld [vmem:[%s1815_s7 + $0x1b8] sm:$0xff]  ;;  %v537_v40 = vld [vmem:[%s1815_s7 + $0x1c0] sm:$0xff] }
  0x80   : > { %v791_v37 = vadd.f32 %v535_v35, %v279_v34  ;;  %1045 = vst [vmem:[%s1830_s21 + $0x1a0] sm:$0xff] %v789_v32  ;;  %1046 = vst [vmem:[%s1830_s21 + $0x1a8] sm:$0xff] %v790_v33  ;;  %v792_v41 = vadd.f32 %v536_v38, %v280_v36  ;;  %v793_v42 = vadd.f32 %v537_v40, %v281_v39  ;;  %v282_v43 = vld [vmem:[%s1808_s5 + $0x1c8] sm:$0xff]  ;;  %v283_v45 = vld [vmem:[%s1808_s5 + $0x1d0] sm:$0xff] }
  0x81   : > { %v538_v44 = vld [vmem:[%s1815_s7 + $0x1c8] sm:$0xff]  ;;  %v539_v47 = vld [vmem:[%s1815_s7 + $0x1d0] sm:$0xff]  ;;  %v284_v48 = vld [vmem:[%s1808_s5 + $0x1d8] sm:$0xff] }
  0x82   : > { %1047 = vst [vmem:[%s1830_s21 + $0x1b0] sm:$0xff] %v791_v37  ;;  %v794_v46 = vadd.f32 %v538_v44, %v282_v43  ;;  %v540_v49 = vld [vmem:[%s1815_s7 + $0x1d8] sm:$0xff]  ;;  %1048 = vst [vmem:[%s1830_s21 + $0x1b8] sm:$0xff] %v792_v41  ;;  %v795_v50 = vadd.f32 %v539_v47, %v283_v45  ;;  %v285_v52 = vld [vmem:[%s1808_s5 + $0x1e0] sm:$0xff] }
  0x83   : > { %1049 = vst [vmem:[%s1830_s21 + $0x1c0] sm:$0xff] %v793_v42  ;;  %v796_v51 = vadd.f32 %v540_v49, %v284_v48  ;;  %v541_v53 = vld [vmem:[%s1815_s7 + $0x1e0] sm:$0xff]  ;;  %v286_v54 = vld [vmem:[%s1808_s5 + $0x1e8] sm:$0xff]  ;;  %v287_v57 = vld [vmem:[%s1808_s5 + $0x1f0] sm:$0xff] }
  0x84   : > { %1050 = vst [vmem:[%s1830_s21 + $0x1c8] sm:$0xff] %v794_v46  ;;  %v797_v55 = vadd.f32 %v541_v53, %v285_v52  ;;  %v542_v56 = vld [vmem:[%s1815_s7 + $0x1e8] sm:$0xff]  ;;  %v543_v58 = vld [vmem:[%s1815_s7 + $0x1f0] sm:$0xff]  ;;  %1051 = vst [vmem:[%s1830_s21 + $0x1d0] sm:$0xff] %v795_v50 }
  0x85   : > { %1052 = vst [vmem:[%s1830_s21 + $0x1d8] sm:$0xff] %v796_v51  ;;  %v798_v59 = vadd.f32 %v542_v56, %v286_v54  ;;  %v799_v60 = vadd.f32 %v543_v58, %v287_v57  ;;  %v288_v61 = vld [vmem:[%s1808_s5 + $0x1f8] sm:$0xff]  ;;  %v289_v63 = vld [vmem:[%s1808_s5 + $0x200] sm:$0xff]  ;;  %v290_v2 = vld [vmem:[%s1808_s5 + $0x208] sm:$0xff] }
  0x86   : > { %v544_v62 = vld [vmem:[%s1815_s7 + $0x1f8] sm:$0xff]  ;;  %1053 = vst [vmem:[%s1830_s21 + $0x1e0] sm:$0xff] %v797_v55  ;;  %v545_v1 = vld [vmem:[%s1815_s7 + $0x200] sm:$0xff]  ;;  %v546_v3 = vld [vmem:[%s1815_s7 + $0x208] sm:$0xff] }
  0x87   : > { %v800_v0 = vadd.f32 %v544_v62, %v288_v61  ;;  %1054 = vst [vmem:[%s1830_s21 + $0x1e8] sm:$0xff] %v798_v59  ;;  %1055 = vst [vmem:[%s1830_s21 + $0x1f0] sm:$0xff] %v799_v60  ;;  %v801_v4 = vadd.f32 %v545_v1, %v289_v63  ;;  %v802_v5 = vadd.f32 %v546_v3, %v290_v2  ;;  %v291_v6 = vld [vmem:[%s1808_s5 + $0x210] sm:$0xff]  ;;  %v292_v8 = vld [vmem:[%s1808_s5 + $0x218] sm:$0xff] }
  0x88   : > { %v547_v7 = vld [vmem:[%s1815_s7 + $0x210] sm:$0xff]  ;;  %v548_v10 = vld [vmem:[%s1815_s7 + $0x218] sm:$0xff]  ;;  %v293_v11 = vld [vmem:[%s1808_s5 + $0x220] sm:$0xff] }
  0x89   : > { %1056 = vst [vmem:[%s1830_s21 + $0x1f8] sm:$0xff] %v800_v0  ;;  %v803_v9 = vadd.f32 %v547_v7, %v291_v6  ;;  %v549_v12 = vld [vmem:[%s1815_s7 + $0x220] sm:$0xff]  ;;  %1057 = vst [vmem:[%s1830_s21 + $0x200] sm:$0xff] %v801_v4  ;;  %v804_v13 = vadd.f32 %v548_v10, %v292_v8  ;;  %v294_v15 = vld [vmem:[%s1808_s5 + $0x228] sm:$0xff] }
  0x8a   : > { %1058 = vst [vmem:[%s1830_s21 + $0x208] sm:$0xff] %v802_v5  ;;  %v805_v14 = vadd.f32 %v549_v12, %v293_v11  ;;  %v550_v16 = vld [vmem:[%s1815_s7 + $0x228] sm:$0xff]  ;;  %v295_v17 = vld [vmem:[%s1808_s5 + $0x230] sm:$0xff]  ;;  %v296_v20 = vld [vmem:[%s1808_s5 + $0x238] sm:$0xff] }
  0x8b   : > { %1059 = vst [vmem:[%s1830_s21 + $0x210] sm:$0xff] %v803_v9  ;;  %v806_v18 = vadd.f32 %v550_v16, %v294_v15  ;;  %v551_v19 = vld [vmem:[%s1815_s7 + $0x230] sm:$0xff]  ;;  %v552_v21 = vld [vmem:[%s1815_s7 + $0x238] sm:$0xff]  ;;  %1060 = vst [vmem:[%s1830_s21 + $0x218] sm:$0xff] %v804_v13 }
  0x8c   : > { %1061 = vst [vmem:[%s1830_s21 + $0x220] sm:$0xff] %v805_v14  ;;  %v807_v22 = vadd.f32 %v551_v19, %v295_v17  ;;  %v808_v23 = vadd.f32 %v552_v21, %v296_v20  ;;  %v297_v24 = vld [vmem:[%s1808_s5 + $0x240] sm:$0xff]  ;;  %v298_v26 = vld [vmem:[%s1808_s5 + $0x248] sm:$0xff]  ;;  %v299_v29 = vld [vmem:[%s1808_s5 + $0x250] sm:$0xff] }
  0x8d   : > { %v553_v25 = vld [vmem:[%s1815_s7 + $0x240] sm:$0xff]  ;;  %1062 = vst [vmem:[%s1830_s21 + $0x228] sm:$0xff] %v806_v18  ;;  %v554_v28 = vld [vmem:[%s1815_s7 + $0x248] sm:$0xff]  ;;  %v555_v30 = vld [vmem:[%s1815_s7 + $0x250] sm:$0xff] }
  0x8e   : > { %v809_v27 = vadd.f32 %v553_v25, %v297_v24  ;;  %1063 = vst [vmem:[%s1830_s21 + $0x230] sm:$0xff] %v807_v22  ;;  %1064 = vst [vmem:[%s1830_s21 + $0x238] sm:$0xff] %v808_v23  ;;  %v810_v31 = vadd.f32 %v554_v28, %v298_v26  ;;  %v811_v32 = vadd.f32 %v555_v30, %v299_v29  ;;  %v300_v33 = vld [vmem:[%s1808_s5 + $0x258] sm:$0xff]  ;;  %v301_v35 = vld [vmem:[%s1808_s5 + $0x260] sm:$0xff] }
  0x8f   : > { %v556_v34 = vld [vmem:[%s1815_s7 + $0x258] sm:$0xff]  ;;  %v557_v37 = vld [vmem:[%s1815_s7 + $0x260] sm:$0xff]  ;;  %v302_v38 = vld [vmem:[%s1808_s5 + $0x268] sm:$0xff] }
  0x90   : > { %1065 = vst [vmem:[%s1830_s21 + $0x240] sm:$0xff] %v809_v27  ;;  %v812_v36 = vadd.f32 %v556_v34, %v300_v33  ;;  %v558_v39 = vld [vmem:[%s1815_s7 + $0x268] sm:$0xff]  ;;  %1066 = vst [vmem:[%s1830_s21 + $0x248] sm:$0xff] %v810_v31  ;;  %v813_v40 = vadd.f32 %v557_v37, %v301_v35  ;;  %v303_v42 = vld [vmem:[%s1808_s5 + $0x270] sm:$0xff] }
  0x91   : > { %1067 = vst [vmem:[%s1830_s21 + $0x250] sm:$0xff] %v811_v32  ;;  %v814_v41 = vadd.f32 %v558_v39, %v302_v38  ;;  %v559_v43 = vld [vmem:[%s1815_s7 + $0x270] sm:$0xff]  ;;  %v304_v44 = vld [vmem:[%s1808_s5 + $0x278] sm:$0xff]  ;;  %v305_v47 = vld [vmem:[%s1808_s5 + $0x280] sm:$0xff] }
  0x92   : > { %1068 = vst [vmem:[%s1830_s21 + $0x258] sm:$0xff] %v812_v36  ;;  %v815_v45 = vadd.f32 %v559_v43, %v303_v42  ;;  %v560_v46 = vld [vmem:[%s1815_s7 + $0x278] sm:$0xff]  ;;  %v561_v48 = vld [vmem:[%s1815_s7 + $0x280] sm:$0xff]  ;;  %1069 = vst [vmem:[%s1830_s21 + $0x260] sm:$0xff] %v813_v40 }
  0x93   : > { %1070 = vst [vmem:[%s1830_s21 + $0x268] sm:$0xff] %v814_v41  ;;  %v816_v49 = vadd.f32 %v560_v46, %v304_v44  ;;  %v817_v50 = vadd.f32 %v561_v48, %v305_v47  ;;  %v306_v51 = vld [vmem:[%s1808_s5 + $0x288] sm:$0xff]  ;;  %v307_v53 = vld [vmem:[%s1808_s5 + $0x290] sm:$0xff]  ;;  %v308_v56 = vld [vmem:[%s1808_s5 + $0x298] sm:$0xff] }
  0x94   : > { %v562_v52 = vld [vmem:[%s1815_s7 + $0x288] sm:$0xff]  ;;  %1071 = vst [vmem:[%s1830_s21 + $0x270] sm:$0xff] %v815_v45  ;;  %v563_v55 = vld [vmem:[%s1815_s7 + $0x290] sm:$0xff]  ;;  %v564_v57 = vld [vmem:[%s1815_s7 + $0x298] sm:$0xff] }
  0x95   : > { %v818_v54 = vadd.f32 %v562_v52, %v306_v51  ;;  %1072 = vst [vmem:[%s1830_s21 + $0x278] sm:$0xff] %v816_v49  ;;  %1073 = vst [vmem:[%s1830_s21 + $0x280] sm:$0xff] %v817_v50  ;;  %v819_v58 = vadd.f32 %v563_v55, %v307_v53  ;;  %v820_v59 = vadd.f32 %v564_v57, %v308_v56  ;;  %v309_v60 = vld [vmem:[%s1808_s5 + $0x2a0] sm:$0xff]  ;;  %v310_v62 = vld [vmem:[%s1808_s5 + $0x2a8] sm:$0xff] }
  0x96   : > { %v565_v61 = vld [vmem:[%s1815_s7 + $0x2a0] sm:$0xff]  ;;  %v566_v0 = vld [vmem:[%s1815_s7 + $0x2a8] sm:$0xff]  ;;  %v311_v1 = vld [vmem:[%s1808_s5 + $0x2b0] sm:$0xff] }
  0x97   : > { %1074 = vst [vmem:[%s1830_s21 + $0x288] sm:$0xff] %v818_v54  ;;  %v821_v63 = vadd.f32 %v565_v61, %v309_v60  ;;  %v567_v2 = vld [vmem:[%s1815_s7 + $0x2b0] sm:$0xff]  ;;  %1075 = vst [vmem:[%s1830_s21 + $0x290] sm:$0xff] %v819_v58  ;;  %v822_v3 = vadd.f32 %v566_v0, %v310_v62  ;;  %v312_v5 = vld [vmem:[%s1808_s5 + $0x2b8] sm:$0xff] }
  0x98   : > { %1076 = vst [vmem:[%s1830_s21 + $0x298] sm:$0xff] %v820_v59  ;;  %v823_v4 = vadd.f32 %v567_v2, %v311_v1  ;;  %v568_v6 = vld [vmem:[%s1815_s7 + $0x2b8] sm:$0xff]  ;;  %v313_v7 = vld [vmem:[%s1808_s5 + $0x2c0] sm:$0xff]  ;;  %v314_v10 = vld [vmem:[%s1808_s5 + $0x2c8] sm:$0xff] }
  0x99   : > { %1077 = vst [vmem:[%s1830_s21 + $0x2a0] sm:$0xff] %v821_v63  ;;  %v824_v8 = vadd.f32 %v568_v6, %v312_v5  ;;  %v569_v9 = vld [vmem:[%s1815_s7 + $0x2c0] sm:$0xff]  ;;  %v570_v11 = vld [vmem:[%s1815_s7 + $0x2c8] sm:$0xff]  ;;  %1078 = vst [vmem:[%s1830_s21 + $0x2a8] sm:$0xff] %v822_v3 }
  0x9a   : > { %1079 = vst [vmem:[%s1830_s21 + $0x2b0] sm:$0xff] %v823_v4  ;;  %v825_v12 = vadd.f32 %v569_v9, %v313_v7  ;;  %v826_v13 = vadd.f32 %v570_v11, %v314_v10  ;;  %v315_v14 = vld [vmem:[%s1808_s5 + $0x2d0] sm:$0xff]  ;;  %v316_v16 = vld [vmem:[%s1808_s5 + $0x2d8] sm:$0xff]  ;;  %v317_v19 = vld [vmem:[%s1808_s5 + $0x2e0] sm:$0xff] }
  0x9b   : > { %v571_v15 = vld [vmem:[%s1815_s7 + $0x2d0] sm:$0xff]  ;;  %1080 = vst [vmem:[%s1830_s21 + $0x2b8] sm:$0xff] %v824_v8  ;;  %v572_v18 = vld [vmem:[%s1815_s7 + $0x2d8] sm:$0xff]  ;;  %v573_v20 = vld [vmem:[%s1815_s7 + $0x2e0] sm:$0xff] }
  0x9c   : > { %v827_v17 = vadd.f32 %v571_v15, %v315_v14  ;;  %1081 = vst [vmem:[%s1830_s21 + $0x2c0] sm:$0xff] %v825_v12  ;;  %1082 = vst [vmem:[%s1830_s21 + $0x2c8] sm:$0xff] %v826_v13  ;;  %v828_v21 = vadd.f32 %v572_v18, %v316_v16  ;;  %v829_v22 = vadd.f32 %v573_v20, %v317_v19  ;;  %v318_v23 = vld [vmem:[%s1808_s5 + $0x2e8] sm:$0xff]  ;;  %v319_v25 = vld [vmem:[%s1808_s5 + $0x2f0] sm:$0xff] }
  0x9d   : > { %v574_v24 = vld [vmem:[%s1815_s7 + $0x2e8] sm:$0xff]  ;;  %v575_v27 = vld [vmem:[%s1815_s7 + $0x2f0] sm:$0xff]  ;;  %v320_v28 = vld [vmem:[%s1808_s5 + $0x2f8] sm:$0xff] }
  0x9e   : > { %1083 = vst [vmem:[%s1830_s21 + $0x2d0] sm:$0xff] %v827_v17  ;;  %v830_v26 = vadd.f32 %v574_v24, %v318_v23  ;;  %v576_v29 = vld [vmem:[%s1815_s7 + $0x2f8] sm:$0xff]  ;;  %1084 = vst [vmem:[%s1830_s21 + $0x2d8] sm:$0xff] %v828_v21  ;;  %v831_v30 = vadd.f32 %v575_v27, %v319_v25  ;;  %v321_v32 = vld [vmem:[%s1808_s5 + $0x300] sm:$0xff] }
  0x9f   : > { %1085 = vst [vmem:[%s1830_s21 + $0x2e0] sm:$0xff] %v829_v22  ;;  %v832_v31 = vadd.f32 %v576_v29, %v320_v28  ;;  %v577_v33 = vld [vmem:[%s1815_s7 + $0x300] sm:$0xff]  ;;  %v322_v34 = vld [vmem:[%s1808_s5 + $0x308] sm:$0xff]  ;;  %v323_v37 = vld [vmem:[%s1808_s5 + $0x310] sm:$0xff] }
  0xa0   : > { %1086 = vst [vmem:[%s1830_s21 + $0x2e8] sm:$0xff] %v830_v26  ;;  %v833_v35 = vadd.f32 %v577_v33, %v321_v32  ;;  %v578_v36 = vld [vmem:[%s1815_s7 + $0x308] sm:$0xff]  ;;  %v579_v38 = vld [vmem:[%s1815_s7 + $0x310] sm:$0xff]  ;;  %1087 = vst [vmem:[%s1830_s21 + $0x2f0] sm:$0xff] %v831_v30 }
  0xa1   : > { %1088 = vst [vmem:[%s1830_s21 + $0x2f8] sm:$0xff] %v832_v31  ;;  %v834_v39 = vadd.f32 %v578_v36, %v322_v34  ;;  %v835_v40 = vadd.f32 %v579_v38, %v323_v37  ;;  %v324_v41 = vld [vmem:[%s1808_s5 + $0x318] sm:$0xff]  ;;  %v325_v43 = vld [vmem:[%s1808_s5 + $0x320] sm:$0xff]  ;;  %v326_v46 = vld [vmem:[%s1808_s5 + $0x328] sm:$0xff] }
  0xa2   : > { %v580_v42 = vld [vmem:[%s1815_s7 + $0x318] sm:$0xff]  ;;  %1089 = vst [vmem:[%s1830_s21 + $0x300] sm:$0xff] %v833_v35  ;;  %v581_v45 = vld [vmem:[%s1815_s7 + $0x320] sm:$0xff]  ;;  %v582_v47 = vld [vmem:[%s1815_s7 + $0x328] sm:$0xff] }
  0xa3   : > { %v836_v44 = vadd.f32 %v580_v42, %v324_v41  ;;  %1090 = vst [vmem:[%s1830_s21 + $0x308] sm:$0xff] %v834_v39  ;;  %1091 = vst [vmem:[%s1830_s21 + $0x310] sm:$0xff] %v835_v40  ;;  %v837_v48 = vadd.f32 %v581_v45, %v325_v43  ;;  %v838_v49 = vadd.f32 %v582_v47, %v326_v46  ;;  %v327_v50 = vld [vmem:[%s1808_s5 + $0x330] sm:$0xff]  ;;  %v328_v52 = vld [vmem:[%s1808_s5 + $0x338] sm:$0xff] }
  0xa4   : > { %v583_v51 = vld [vmem:[%s1815_s7 + $0x330] sm:$0xff]  ;;  %v584_v54 = vld [vmem:[%s1815_s7 + $0x338] sm:$0xff]  ;;  %v329_v55 = vld [vmem:[%s1808_s5 + $0x340] sm:$0xff] }
  0xa5   : > { %1092 = vst [vmem:[%s1830_s21 + $0x318] sm:$0xff] %v836_v44  ;;  %v839_v53 = vadd.f32 %v583_v51, %v327_v50  ;;  %v585_v56 = vld [vmem:[%s1815_s7 + $0x340] sm:$0xff]  ;;  %1093 = vst [vmem:[%s1830_s21 + $0x320] sm:$0xff] %v837_v48  ;;  %v840_v57 = vadd.f32 %v584_v54, %v328_v52  ;;  %v330_v59 = vld [vmem:[%s1808_s5 + $0x348] sm:$0xff] }
  0xa6   : > { %1094 = vst [vmem:[%s1830_s21 + $0x328] sm:$0xff] %v838_v49  ;;  %v841_v58 = vadd.f32 %v585_v56, %v329_v55  ;;  %v586_v60 = vld [vmem:[%s1815_s7 + $0x348] sm:$0xff]  ;;  %v331_v61 = vld [vmem:[%s1808_s5 + $0x350] sm:$0xff]  ;;  %v332_v0 = vld [vmem:[%s1808_s5 + $0x358] sm:$0xff] }
  0xa7   : > { %1095 = vst [vmem:[%s1830_s21 + $0x330] sm:$0xff] %v839_v53  ;;  %v842_v62 = vadd.f32 %v586_v60, %v330_v59  ;;  %v587_v63 = vld [vmem:[%s1815_s7 + $0x350] sm:$0xff]  ;;  %v588_v1 = vld [vmem:[%s1815_s7 + $0x358] sm:$0xff]  ;;  %1096 = vst [vmem:[%s1830_s21 + $0x338] sm:$0xff] %v840_v57 }
  0xa8   : > { %1097 = vst [vmem:[%s1830_s21 + $0x340] sm:$0xff] %v841_v58  ;;  %v843_v2 = vadd.f32 %v587_v63, %v331_v61  ;;  %v844_v3 = vadd.f32 %v588_v1, %v332_v0  ;;  %v333_v4 = vld [vmem:[%s1808_s5 + $0x360] sm:$0xff]  ;;  %v334_v6 = vld [vmem:[%s1808_s5 + $0x368] sm:$0xff]  ;;  %v335_v9 = vld [vmem:[%s1808_s5 + $0x370] sm:$0xff] }
  0xa9   : > { %v589_v5 = vld [vmem:[%s1815_s7 + $0x360] sm:$0xff]  ;;  %1098 = vst [vmem:[%s1830_s21 + $0x348] sm:$0xff] %v842_v62  ;;  %v590_v8 = vld [vmem:[%s1815_s7 + $0x368] sm:$0xff]  ;;  %v591_v10 = vld [vmem:[%s1815_s7 + $0x370] sm:$0xff] }
  0xaa   : > { %v845_v7 = vadd.f32 %v589_v5, %v333_v4  ;;  %1099 = vst [vmem:[%s1830_s21 + $0x350] sm:$0xff] %v843_v2  ;;  %1100 = vst [vmem:[%s1830_s21 + $0x358] sm:$0xff] %v844_v3  ;;  %v846_v11 = vadd.f32 %v590_v8, %v334_v6  ;;  %v847_v12 = vadd.f32 %v591_v10, %v335_v9  ;;  %v336_v13 = vld [vmem:[%s1808_s5 + $0x378] sm:$0xff]  ;;  %v337_v15 = vld [vmem:[%s1808_s5 + $0x380] sm:$0xff] }
  0xab   : > { %v592_v14 = vld [vmem:[%s1815_s7 + $0x378] sm:$0xff]  ;;  %v593_v17 = vld [vmem:[%s1815_s7 + $0x380] sm:$0xff]  ;;  %v338_v18 = vld [vmem:[%s1808_s5 + $0x388] sm:$0xff] }
  0xac   : > { %1101 = vst [vmem:[%s1830_s21 + $0x360] sm:$0xff] %v845_v7  ;;  %v848_v16 = vadd.f32 %v592_v14, %v336_v13  ;;  %v594_v19 = vld [vmem:[%s1815_s7 + $0x388] sm:$0xff]  ;;  %1102 = vst [vmem:[%s1830_s21 + $0x368] sm:$0xff] %v846_v11  ;;  %v849_v20 = vadd.f32 %v593_v17, %v337_v15  ;;  %v339_v22 = vld [vmem:[%s1808_s5 + $0x390] sm:$0xff] }
  0xad   : > { %1103 = vst [vmem:[%s1830_s21 + $0x370] sm:$0xff] %v847_v12  ;;  %v850_v21 = vadd.f32 %v594_v19, %v338_v18  ;;  %v595_v23 = vld [vmem:[%s1815_s7 + $0x390] sm:$0xff]  ;;  %v340_v24 = vld [vmem:[%s1808_s5 + $0x398] sm:$0xff]  ;;  %v341_v27 = vld [vmem:[%s1808_s5 + $0x3a0] sm:$0xff] }
  0xae   : > { %1104 = vst [vmem:[%s1830_s21 + $0x378] sm:$0xff] %v848_v16  ;;  %v851_v25 = vadd.f32 %v595_v23, %v339_v22  ;;  %v596_v26 = vld [vmem:[%s1815_s7 + $0x398] sm:$0xff]  ;;  %v597_v28 = vld [vmem:[%s1815_s7 + $0x3a0] sm:$0xff]  ;;  %1105 = vst [vmem:[%s1830_s21 + $0x380] sm:$0xff] %v849_v20 }
  0xaf   : > { %1106 = vst [vmem:[%s1830_s21 + $0x388] sm:$0xff] %v850_v21  ;;  %v852_v29 = vadd.f32 %v596_v26, %v340_v24  ;;  %v853_v30 = vadd.f32 %v597_v28, %v341_v27  ;;  %v342_v31 = vld [vmem:[%s1808_s5 + $0x3a8] sm:$0xff]  ;;  %v343_v33 = vld [vmem:[%s1808_s5 + $0x3b0] sm:$0xff]  ;;  %v344_v36 = vld [vmem:[%s1808_s5 + $0x3b8] sm:$0xff] }
  0xb0   : > { %v598_v32 = vld [vmem:[%s1815_s7 + $0x3a8] sm:$0xff]  ;;  %1107 = vst [vmem:[%s1830_s21 + $0x390] sm:$0xff] %v851_v25  ;;  %v599_v35 = vld [vmem:[%s1815_s7 + $0x3b0] sm:$0xff]  ;;  %v600_v37 = vld [vmem:[%s1815_s7 + $0x3b8] sm:$0xff] }
  0xb1   : > { %v854_v34 = vadd.f32 %v598_v32, %v342_v31  ;;  %1108 = vst [vmem:[%s1830_s21 + $0x398] sm:$0xff] %v852_v29  ;;  %1109 = vst [vmem:[%s1830_s21 + $0x3a0] sm:$0xff] %v853_v30  ;;  %v855_v38 = vadd.f32 %v599_v35, %v343_v33  ;;  %v856_v39 = vadd.f32 %v600_v37, %v344_v36  ;;  %v345_v40 = vld [vmem:[%s1808_s5 + $0x3c0] sm:$0xff]  ;;  %v346_v42 = vld [vmem:[%s1808_s5 + $0x3c8] sm:$0xff] }
  0xb2   : > { %v601_v41 = vld [vmem:[%s1815_s7 + $0x3c0] sm:$0xff]  ;;  %v602_v44 = vld [vmem:[%s1815_s7 + $0x3c8] sm:$0xff]  ;;  %v347_v45 = vld [vmem:[%s1808_s5 + $0x3d0] sm:$0xff] }
  0xb3   : > { %1110 = vst [vmem:[%s1830_s21 + $0x3a8] sm:$0xff] %v854_v34  ;;  %v857_v43 = vadd.f32 %v601_v41, %v345_v40  ;;  %v603_v46 = vld [vmem:[%s1815_s7 + $0x3d0] sm:$0xff]  ;;  %1111 = vst [vmem:[%s1830_s21 + $0x3b0] sm:$0xff] %v855_v38  ;;  %v858_v47 = vadd.f32 %v602_v44, %v346_v42  ;;  %v348_v49 = vld [vmem:[%s1808_s5 + $0x3d8] sm:$0xff] }
  0xb4   : > { %1112 = vst [vmem:[%s1830_s21 + $0x3b8] sm:$0xff] %v856_v39  ;;  %v859_v48 = vadd.f32 %v603_v46, %v347_v45  ;;  %v604_v50 = vld [vmem:[%s1815_s7 + $0x3d8] sm:$0xff]  ;;  %v349_v51 = vld [vmem:[%s1808_s5 + $0x3e0] sm:$0xff]  ;;  %v350_v54 = vld [vmem:[%s1808_s5 + $0x3e8] sm:$0xff] }
  0xb5   : > { %1113 = vst [vmem:[%s1830_s21 + $0x3c0] sm:$0xff] %v857_v43  ;;  %v860_v52 = vadd.f32 %v604_v50, %v348_v49  ;;  %v605_v53 = vld [vmem:[%s1815_s7 + $0x3e0] sm:$0xff]  ;;  %v606_v55 = vld [vmem:[%s1815_s7 + $0x3e8] sm:$0xff]  ;;  %1114 = vst [vmem:[%s1830_s21 + $0x3c8] sm:$0xff] %v858_v47 }
  0xb6   : > { %1115 = vst [vmem:[%s1830_s21 + $0x3d0] sm:$0xff] %v859_v48  ;;  %v861_v56 = vadd.f32 %v605_v53, %v349_v51  ;;  %v862_v57 = vadd.f32 %v606_v55, %v350_v54  ;;  %v351_v58 = vld [vmem:[%s1808_s5 + $0x3f0] sm:$0xff]  ;;  %v352_v60 = vld [vmem:[%s1808_s5 + $0x3f8] sm:$0xff]  ;;  %v353_v63 = vld [vmem:[%s1808_s5 + $0x400] sm:$0xff] }
  0xb7   : > { %v607_v59 = vld [vmem:[%s1815_s7 + $0x3f0] sm:$0xff]  ;;  %1116 = vst [vmem:[%s1830_s21 + $0x3d8] sm:$0xff] %v860_v52  ;;  %v608_v62 = vld [vmem:[%s1815_s7 + $0x3f8] sm:$0xff]  ;;  %v609_v0 = vld [vmem:[%s1815_s7 + $0x400] sm:$0xff] }
  0xb8   : > { %v863_v61 = vadd.f32 %v607_v59, %v351_v58  ;;  %1117 = vst [vmem:[%s1830_s21 + $0x3e0] sm:$0xff] %v861_v56  ;;  %1118 = vst [vmem:[%s1830_s21 + $0x3e8] sm:$0xff] %v862_v57  ;;  %v864_v1 = vadd.f32 %v608_v62, %v352_v60  ;;  %v865_v2 = vadd.f32 %v609_v0, %v353_v63  ;;  %v354_v3 = vld [vmem:[%s1808_s5 + $0x408] sm:$0xff]  ;;  %v355_v5 = vld [vmem:[%s1808_s5 + $0x410] sm:$0xff] }
  0xb9   : > { %v610_v4 = vld [vmem:[%s1815_s7 + $0x408] sm:$0xff]  ;;  %v611_v7 = vld [vmem:[%s1815_s7 + $0x410] sm:$0xff]  ;;  %v356_v8 = vld [vmem:[%s1808_s5 + $0x418] sm:$0xff] }
  0xba   : > { %1119 = vst [vmem:[%s1830_s21 + $0x3f0] sm:$0xff] %v863_v61  ;;  %v866_v6 = vadd.f32 %v610_v4, %v354_v3  ;;  %v612_v9 = vld [vmem:[%s1815_s7 + $0x418] sm:$0xff]  ;;  %1120 = vst [vmem:[%s1830_s21 + $0x3f8] sm:$0xff] %v864_v1  ;;  %v867_v10 = vadd.f32 %v611_v7, %v355_v5  ;;  %v357_v12 = vld [vmem:[%s1808_s5 + $0x420] sm:$0xff] }
  0xbb   : > { %1121 = vst [vmem:[%s1830_s21 + $0x400] sm:$0xff] %v865_v2  ;;  %v868_v11 = vadd.f32 %v612_v9, %v356_v8  ;;  %v613_v13 = vld [vmem:[%s1815_s7 + $0x420] sm:$0xff]  ;;  %v358_v14 = vld [vmem:[%s1808_s5 + $0x428] sm:$0xff]  ;;  %v359_v17 = vld [vmem:[%s1808_s5 + $0x430] sm:$0xff] }
  0xbc   : > { %1122 = vst [vmem:[%s1830_s21 + $0x408] sm:$0xff] %v866_v6  ;;  %v869_v15 = vadd.f32 %v613_v13, %v357_v12  ;;  %v614_v16 = vld [vmem:[%s1815_s7 + $0x428] sm:$0xff]  ;;  %v615_v18 = vld [vmem:[%s1815_s7 + $0x430] sm:$0xff]  ;;  %1123 = vst [vmem:[%s1830_s21 + $0x410] sm:$0xff] %v867_v10 }
  0xbd   : > { %1124 = vst [vmem:[%s1830_s21 + $0x418] sm:$0xff] %v868_v11  ;;  %v870_v19 = vadd.f32 %v614_v16, %v358_v14  ;;  %v871_v20 = vadd.f32 %v615_v18, %v359_v17  ;;  %v360_v21 = vld [vmem:[%s1808_s5 + $0x438] sm:$0xff]  ;;  %v361_v23 = vld [vmem:[%s1808_s5 + $0x440] sm:$0xff]  ;;  %v362_v26 = vld [vmem:[%s1808_s5 + $0x448] sm:$0xff] }
  0xbe   : > { %v616_v22 = vld [vmem:[%s1815_s7 + $0x438] sm:$0xff]  ;;  %1125 = vst [vmem:[%s1830_s21 + $0x420] sm:$0xff] %v869_v15  ;;  %v617_v25 = vld [vmem:[%s1815_s7 + $0x440] sm:$0xff]  ;;  %v618_v27 = vld [vmem:[%s1815_s7 + $0x448] sm:$0xff] }
  0xbf   : > { %v872_v24 = vadd.f32 %v616_v22, %v360_v21  ;;  %1126 = vst [vmem:[%s1830_s21 + $0x428] sm:$0xff] %v870_v19  ;;  %1127 = vst [vmem:[%s1830_s21 + $0x430] sm:$0xff] %v871_v20  ;;  %v873_v28 = vadd.f32 %v617_v25, %v361_v23  ;;  %v874_v29 = vadd.f32 %v618_v27, %v362_v26  ;;  %v363_v30 = vld [vmem:[%s1808_s5 + $0x450] sm:$0xff]  ;;  %v364_v32 = vld [vmem:[%s1808_s5 + $0x458] sm:$0xff] }
  0xc0   : > { %v619_v31 = vld [vmem:[%s1815_s7 + $0x450] sm:$0xff]  ;;  %v620_v34 = vld [vmem:[%s1815_s7 + $0x458] sm:$0xff]  ;;  %v365_v35 = vld [vmem:[%s1808_s5 + $0x460] sm:$0xff] }
  0xc1   : > { %1128 = vst [vmem:[%s1830_s21 + $0x438] sm:$0xff] %v872_v24  ;;  %v875_v33 = vadd.f32 %v619_v31, %v363_v30  ;;  %v621_v36 = vld [vmem:[%s1815_s7 + $0x460] sm:$0xff]  ;;  %1129 = vst [vmem:[%s1830_s21 + $0x440] sm:$0xff] %v873_v28  ;;  %v876_v37 = vadd.f32 %v620_v34, %v364_v32  ;;  %v366_v39 = vld [vmem:[%s1808_s5 + $0x468] sm:$0xff] }
  0xc2   : > { %1130 = vst [vmem:[%s1830_s21 + $0x448] sm:$0xff] %v874_v29  ;;  %v877_v38 = vadd.f32 %v621_v36, %v365_v35  ;;  %v622_v40 = vld [vmem:[%s1815_s7 + $0x468] sm:$0xff]  ;;  %v367_v41 = vld [vmem:[%s1808_s5 + $0x470] sm:$0xff]  ;;  %v368_v44 = vld [vmem:[%s1808_s5 + $0x478] sm:$0xff] }
  0xc3   : > { %1131 = vst [vmem:[%s1830_s21 + $0x450] sm:$0xff] %v875_v33  ;;  %v878_v42 = vadd.f32 %v622_v40, %v366_v39  ;;  %v623_v43 = vld [vmem:[%s1815_s7 + $0x470] sm:$0xff]  ;;  %v624_v45 = vld [vmem:[%s1815_s7 + $0x478] sm:$0xff]  ;;  %1132 = vst [vmem:[%s1830_s21 + $0x458] sm:$0xff] %v876_v37 }
  0xc4   : > { %1133 = vst [vmem:[%s1830_s21 + $0x460] sm:$0xff] %v877_v38  ;;  %v879_v46 = vadd.f32 %v623_v43, %v367_v41  ;;  %v880_v47 = vadd.f32 %v624_v45, %v368_v44  ;;  %v369_v48 = vld [vmem:[%s1808_s5 + $0x480] sm:$0xff]  ;;  %v370_v50 = vld [vmem:[%s1808_s5 + $0x488] sm:$0xff]  ;;  %v371_v53 = vld [vmem:[%s1808_s5 + $0x490] sm:$0xff] }
  0xc5   : > { %v625_v49 = vld [vmem:[%s1815_s7 + $0x480] sm:$0xff]  ;;  %1134 = vst [vmem:[%s1830_s21 + $0x468] sm:$0xff] %v878_v42  ;;  %v626_v52 = vld [vmem:[%s1815_s7 + $0x488] sm:$0xff]  ;;  %v627_v54 = vld [vmem:[%s1815_s7 + $0x490] sm:$0xff] }
  0xc6   : > { %v881_v51 = vadd.f32 %v625_v49, %v369_v48  ;;  %1135 = vst [vmem:[%s1830_s21 + $0x470] sm:$0xff] %v879_v46  ;;  %1136 = vst [vmem:[%s1830_s21 + $0x478] sm:$0xff] %v880_v47  ;;  %v882_v55 = vadd.f32 %v626_v52, %v370_v50  ;;  %v883_v56 = vadd.f32 %v627_v54, %v371_v53  ;;  %v372_v57 = vld [vmem:[%s1808_s5 + $0x498] sm:$0xff]  ;;  %v373_v59 = vld [vmem:[%s1808_s5 + $0x4a0] sm:$0xff] }
  0xc7   : > { %v628_v58 = vld [vmem:[%s1815_s7 + $0x498] sm:$0xff]  ;;  %v629_v61 = vld [vmem:[%s1815_s7 + $0x4a0] sm:$0xff]  ;;  %v374_v62 = vld [vmem:[%s1808_s5 + $0x4a8] sm:$0xff] }
  0xc8   : > { %1137 = vst [vmem:[%s1830_s21 + $0x480] sm:$0xff] %v881_v51  ;;  %v884_v60 = vadd.f32 %v628_v58, %v372_v57  ;;  %v630_v63 = vld [vmem:[%s1815_s7 + $0x4a8] sm:$0xff]  ;;  %1138 = vst [vmem:[%s1830_s21 + $0x488] sm:$0xff] %v882_v55  ;;  %v885_v0 = vadd.f32 %v629_v61, %v373_v59  ;;  %v375_v2 = vld [vmem:[%s1808_s5 + $0x4b0] sm:$0xff] }
  0xc9   : > { %1139 = vst [vmem:[%s1830_s21 + $0x490] sm:$0xff] %v883_v56  ;;  %v886_v1 = vadd.f32 %v630_v63, %v374_v62  ;;  %v631_v3 = vld [vmem:[%s1815_s7 + $0x4b0] sm:$0xff]  ;;  %v376_v4 = vld [vmem:[%s1808_s5 + $0x4b8] sm:$0xff]  ;;  %v377_v7 = vld [vmem:[%s1808_s5 + $0x4c0] sm:$0xff] }
  0xca   : > { %1140 = vst [vmem:[%s1830_s21 + $0x498] sm:$0xff] %v884_v60  ;;  %v887_v5 = vadd.f32 %v631_v3, %v375_v2  ;;  %v632_v6 = vld [vmem:[%s1815_s7 + $0x4b8] sm:$0xff]  ;;  %v633_v8 = vld [vmem:[%s1815_s7 + $0x4c0] sm:$0xff]  ;;  %1141 = vst [vmem:[%s1830_s21 + $0x4a0] sm:$0xff] %v885_v0 }
  0xcb   : > { %1142 = vst [vmem:[%s1830_s21 + $0x4a8] sm:$0xff] %v886_v1  ;;  %v888_v9 = vadd.f32 %v632_v6, %v376_v4  ;;  %v889_v10 = vadd.f32 %v633_v8, %v377_v7  ;;  %v378_v11 = vld [vmem:[%s1808_s5 + $0x4c8] sm:$0xff]  ;;  %v379_v13 = vld [vmem:[%s1808_s5 + $0x4d0] sm:$0xff]  ;;  %v380_v16 = vld [vmem:[%s1808_s5 + $0x4d8] sm:$0xff] }
  0xcc   : > { %v634_v12 = vld [vmem:[%s1815_s7 + $0x4c8] sm:$0xff]  ;;  %1143 = vst [vmem:[%s1830_s21 + $0x4b0] sm:$0xff] %v887_v5  ;;  %v635_v15 = vld [vmem:[%s1815_s7 + $0x4d0] sm:$0xff]  ;;  %v636_v17 = vld [vmem:[%s1815_s7 + $0x4d8] sm:$0xff] }
  0xcd   : > { %v890_v14 = vadd.f32 %v634_v12, %v378_v11  ;;  %1144 = vst [vmem:[%s1830_s21 + $0x4b8] sm:$0xff] %v888_v9  ;;  %1145 = vst [vmem:[%s1830_s21 + $0x4c0] sm:$0xff] %v889_v10  ;;  %v891_v18 = vadd.f32 %v635_v15, %v379_v13  ;;  %v892_v19 = vadd.f32 %v636_v17, %v380_v16  ;;  %v381_v20 = vld [vmem:[%s1808_s5 + $0x4e0] sm:$0xff]  ;;  %v382_v22 = vld [vmem:[%s1808_s5 + $0x4e8] sm:$0xff] }
  0xce   : > { %v637_v21 = vld [vmem:[%s1815_s7 + $0x4e0] sm:$0xff]  ;;  %v638_v24 = vld [vmem:[%s1815_s7 + $0x4e8] sm:$0xff]  ;;  %v383_v25 = vld [vmem:[%s1808_s5 + $0x4f0] sm:$0xff] }
  0xcf   : > { %1146 = vst [vmem:[%s1830_s21 + $0x4c8] sm:$0xff] %v890_v14  ;;  %v893_v23 = vadd.f32 %v637_v21, %v381_v20  ;;  %v639_v26 = vld [vmem:[%s1815_s7 + $0x4f0] sm:$0xff]  ;;  %1147 = vst [vmem:[%s1830_s21 + $0x4d0] sm:$0xff] %v891_v18  ;;  %v894_v27 = vadd.f32 %v638_v24, %v382_v22  ;;  %v384_v29 = vld [vmem:[%s1808_s5 + $0x4f8] sm:$0xff] }
  0xd0   : > { %1148 = vst [vmem:[%s1830_s21 + $0x4d8] sm:$0xff] %v892_v19  ;;  %v895_v28 = vadd.f32 %v639_v26, %v383_v25  ;;  %v640_v30 = vld [vmem:[%s1815_s7 + $0x4f8] sm:$0xff]  ;;  %v385_v31 = vld [vmem:[%s1808_s5 + $0x500] sm:$0xff]  ;;  %v386_v34 = vld [vmem:[%s1808_s5 + $0x508] sm:$0xff] }
  0xd1   : > { %1149 = vst [vmem:[%s1830_s21 + $0x4e0] sm:$0xff] %v893_v23  ;;  %v896_v32 = vadd.f32 %v640_v30, %v384_v29  ;;  %v641_v33 = vld [vmem:[%s1815_s7 + $0x500] sm:$0xff]  ;;  %v642_v35 = vld [vmem:[%s1815_s7 + $0x508] sm:$0xff]  ;;  %1150 = vst [vmem:[%s1830_s21 + $0x4e8] sm:$0xff] %v894_v27 }
  0xd2   : > { %1151 = vst [vmem:[%s1830_s21 + $0x4f0] sm:$0xff] %v895_v28  ;;  %v897_v36 = vadd.f32 %v641_v33, %v385_v31  ;;  %v898_v37 = vadd.f32 %v642_v35, %v386_v34  ;;  %v387_v38 = vld [vmem:[%s1808_s5 + $0x510] sm:$0xff]  ;;  %v388_v40 = vld [vmem:[%s1808_s5 + $0x518] sm:$0xff]  ;;  %v389_v43 = vld [vmem:[%s1808_s5 + $0x520] sm:$0xff] }
  0xd3   : > { %v643_v39 = vld [vmem:[%s1815_s7 + $0x510] sm:$0xff]  ;;  %1152 = vst [vmem:[%s1830_s21 + $0x4f8] sm:$0xff] %v896_v32  ;;  %v644_v42 = vld [vmem:[%s1815_s7 + $0x518] sm:$0xff]  ;;  %v645_v44 = vld [vmem:[%s1815_s7 + $0x520] sm:$0xff] }
  0xd4   : > { %v899_v41 = vadd.f32 %v643_v39, %v387_v38  ;;  %1153 = vst [vmem:[%s1830_s21 + $0x500] sm:$0xff] %v897_v36  ;;  %1154 = vst [vmem:[%s1830_s21 + $0x508] sm:$0xff] %v898_v37  ;;  %v900_v45 = vadd.f32 %v644_v42, %v388_v40  ;;  %v901_v46 = vadd.f32 %v645_v44, %v389_v43  ;;  %v390_v47 = vld [vmem:[%s1808_s5 + $0x528] sm:$0xff]  ;;  %v391_v49 = vld [vmem:[%s1808_s5 + $0x530] sm:$0xff] }
  0xd5   : > { %v646_v48 = vld [vmem:[%s1815_s7 + $0x528] sm:$0xff]  ;;  %v647_v51 = vld [vmem:[%s1815_s7 + $0x530] sm:$0xff]  ;;  %v392_v52 = vld [vmem:[%s1808_s5 + $0x538] sm:$0xff] }
  0xd6   : > { %1155 = vst [vmem:[%s1830_s21 + $0x510] sm:$0xff] %v899_v41  ;;  %v902_v50 = vadd.f32 %v646_v48, %v390_v47  ;;  %v648_v53 = vld [vmem:[%s1815_s7 + $0x538] sm:$0xff]  ;;  %1156 = vst [vmem:[%s1830_s21 + $0x518] sm:$0xff] %v900_v45  ;;  %v903_v54 = vadd.f32 %v647_v51, %v391_v49  ;;  %v393_v56 = vld [vmem:[%s1808_s5 + $0x540] sm:$0xff] }
  0xd7   : > { %1157 = vst [vmem:[%s1830_s21 + $0x520] sm:$0xff] %v901_v46  ;;  %v904_v55 = vadd.f32 %v648_v53, %v392_v52  ;;  %v649_v57 = vld [vmem:[%s1815_s7 + $0x540] sm:$0xff]  ;;  %v394_v58 = vld [vmem:[%s1808_s5 + $0x548] sm:$0xff]  ;;  %v395_v61 = vld [vmem:[%s1808_s5 + $0x550] sm:$0xff] }
  0xd8   : > { %1158 = vst [vmem:[%s1830_s21 + $0x528] sm:$0xff] %v902_v50  ;;  %v905_v59 = vadd.f32 %v649_v57, %v393_v56  ;;  %v650_v60 = vld [vmem:[%s1815_s7 + $0x548] sm:$0xff]  ;;  %v651_v62 = vld [vmem:[%s1815_s7 + $0x550] sm:$0xff]  ;;  %1159 = vst [vmem:[%s1830_s21 + $0x530] sm:$0xff] %v903_v54 }
  0xd9   : > { %1160 = vst [vmem:[%s1830_s21 + $0x538] sm:$0xff] %v904_v55  ;;  %v906_v63 = vadd.f32 %v650_v60, %v394_v58  ;;  %v907_v0 = vadd.f32 %v651_v62, %v395_v61  ;;  %v396_v1 = vld [vmem:[%s1808_s5 + $0x558] sm:$0xff]  ;;  %v397_v3 = vld [vmem:[%s1808_s5 + $0x560] sm:$0xff]  ;;  %v398_v6 = vld [vmem:[%s1808_s5 + $0x568] sm:$0xff] }
  0xda   : > { %v652_v2 = vld [vmem:[%s1815_s7 + $0x558] sm:$0xff]  ;;  %1161 = vst [vmem:[%s1830_s21 + $0x540] sm:$0xff] %v905_v59  ;;  %v653_v5 = vld [vmem:[%s1815_s7 + $0x560] sm:$0xff]  ;;  %v654_v7 = vld [vmem:[%s1815_s7 + $0x568] sm:$0xff] }
  0xdb   : > { %v908_v4 = vadd.f32 %v652_v2, %v396_v1  ;;  %1162 = vst [vmem:[%s1830_s21 + $0x548] sm:$0xff] %v906_v63  ;;  %1163 = vst [vmem:[%s1830_s21 + $0x550] sm:$0xff] %v907_v0  ;;  %v909_v8 = vadd.f32 %v653_v5, %v397_v3  ;;  %v910_v9 = vadd.f32 %v654_v7, %v398_v6  ;;  %v399_v10 = vld [vmem:[%s1808_s5 + $0x570] sm:$0xff]  ;;  %v400_v12 = vld [vmem:[%s1808_s5 + $0x578] sm:$0xff] }
  0xdc   : > { %v655_v11 = vld [vmem:[%s1815_s7 + $0x570] sm:$0xff]  ;;  %v656_v14 = vld [vmem:[%s1815_s7 + $0x578] sm:$0xff]  ;;  %v401_v15 = vld [vmem:[%s1808_s5 + $0x580] sm:$0xff] }
  0xdd   : > { %1164 = vst [vmem:[%s1830_s21 + $0x558] sm:$0xff] %v908_v4  ;;  %v911_v13 = vadd.f32 %v655_v11, %v399_v10  ;;  %v657_v16 = vld [vmem:[%s1815_s7 + $0x580] sm:$0xff]  ;;  %1165 = vst [vmem:[%s1830_s21 + $0x560] sm:$0xff] %v909_v8  ;;  %v912_v17 = vadd.f32 %v656_v14, %v400_v12  ;;  %v402_v19 = vld [vmem:[%s1808_s5 + $0x588] sm:$0xff] }
  0xde   : > { %1166 = vst [vmem:[%s1830_s21 + $0x568] sm:$0xff] %v910_v9  ;;  %v913_v18 = vadd.f32 %v657_v16, %v401_v15  ;;  %v658_v20 = vld [vmem:[%s1815_s7 + $0x588] sm:$0xff]  ;;  %v403_v21 = vld [vmem:[%s1808_s5 + $0x590] sm:$0xff]  ;;  %v404_v24 = vld [vmem:[%s1808_s5 + $0x598] sm:$0xff] }
  0xdf   : > { %1167 = vst [vmem:[%s1830_s21 + $0x570] sm:$0xff] %v911_v13  ;;  %v914_v22 = vadd.f32 %v658_v20, %v402_v19  ;;  %v659_v23 = vld [vmem:[%s1815_s7 + $0x590] sm:$0xff]  ;;  %v660_v25 = vld [vmem:[%s1815_s7 + $0x598] sm:$0xff]  ;;  %1168 = vst [vmem:[%s1830_s21 + $0x578] sm:$0xff] %v912_v17 }
  0xe0   : > { %1169 = vst [vmem:[%s1830_s21 + $0x580] sm:$0xff] %v913_v18  ;;  %v915_v26 = vadd.f32 %v659_v23, %v403_v21  ;;  %v916_v27 = vadd.f32 %v660_v25, %v404_v24  ;;  %v405_v28 = vld [vmem:[%s1808_s5 + $0x5a0] sm:$0xff]  ;;  %v406_v30 = vld [vmem:[%s1808_s5 + $0x5a8] sm:$0xff]  ;;  %v407_v33 = vld [vmem:[%s1808_s5 + $0x5b0] sm:$0xff] }
  0xe1   : > { %v661_v29 = vld [vmem:[%s1815_s7 + $0x5a0] sm:$0xff]  ;;  %1170 = vst [vmem:[%s1830_s21 + $0x588] sm:$0xff] %v914_v22  ;;  %v662_v32 = vld [vmem:[%s1815_s7 + $0x5a8] sm:$0xff]  ;;  %v663_v34 = vld [vmem:[%s1815_s7 + $0x5b0] sm:$0xff] }
  0xe2   : > { %v917_v31 = vadd.f32 %v661_v29, %v405_v28  ;;  %1171 = vst [vmem:[%s1830_s21 + $0x590] sm:$0xff] %v915_v26  ;;  %1172 = vst [vmem:[%s1830_s21 + $0x598] sm:$0xff] %v916_v27  ;;  %v918_v35 = vadd.f32 %v662_v32, %v406_v30  ;;  %v919_v36 = vadd.f32 %v663_v34, %v407_v33  ;;  %v408_v37 = vld [vmem:[%s1808_s5 + $0x5b8] sm:$0xff]  ;;  %v409_v39 = vld [vmem:[%s1808_s5 + $0x5c0] sm:$0xff] }
  0xe3   : > { %v664_v38 = vld [vmem:[%s1815_s7 + $0x5b8] sm:$0xff]  ;;  %v665_v41 = vld [vmem:[%s1815_s7 + $0x5c0] sm:$0xff]  ;;  %v410_v42 = vld [vmem:[%s1808_s5 + $0x5c8] sm:$0xff] }
  0xe4   : > { %1173 = vst [vmem:[%s1830_s21 + $0x5a0] sm:$0xff] %v917_v31  ;;  %v920_v40 = vadd.f32 %v664_v38, %v408_v37  ;;  %v666_v43 = vld [vmem:[%s1815_s7 + $0x5c8] sm:$0xff]  ;;  %1174 = vst [vmem:[%s1830_s21 + $0x5a8] sm:$0xff] %v918_v35  ;;  %v921_v44 = vadd.f32 %v665_v41, %v409_v39  ;;  %v411_v46 = vld [vmem:[%s1808_s5 + $0x5d0] sm:$0xff] }
  0xe5   : > { %1175 = vst [vmem:[%s1830_s21 + $0x5b0] sm:$0xff] %v919_v36  ;;  %v922_v45 = vadd.f32 %v666_v43, %v410_v42  ;;  %v667_v47 = vld [vmem:[%s1815_s7 + $0x5d0] sm:$0xff]  ;;  %v412_v48 = vld [vmem:[%s1808_s5 + $0x5d8] sm:$0xff]  ;;  %v413_v51 = vld [vmem:[%s1808_s5 + $0x5e0] sm:$0xff] }
  0xe6   : > { %1176 = vst [vmem:[%s1830_s21 + $0x5b8] sm:$0xff] %v920_v40  ;;  %v923_v49 = vadd.f32 %v667_v47, %v411_v46  ;;  %v668_v50 = vld [vmem:[%s1815_s7 + $0x5d8] sm:$0xff]  ;;  %v669_v52 = vld [vmem:[%s1815_s7 + $0x5e0] sm:$0xff]  ;;  %1177 = vst [vmem:[%s1830_s21 + $0x5c0] sm:$0xff] %v921_v44 }
  0xe7   : > { %1178 = vst [vmem:[%s1830_s21 + $0x5c8] sm:$0xff] %v922_v45  ;;  %v924_v53 = vadd.f32 %v668_v50, %v412_v48  ;;  %v925_v54 = vadd.f32 %v669_v52, %v413_v51  ;;  %v414_v55 = vld [vmem:[%s1808_s5 + $0x5e8] sm:$0xff]  ;;  %v415_v57 = vld [vmem:[%s1808_s5 + $0x5f0] sm:$0xff]  ;;  %v416_v60 = vld [vmem:[%s1808_s5 + $0x5f8] sm:$0xff] }
  0xe8   : > { %v670_v56 = vld [vmem:[%s1815_s7 + $0x5e8] sm:$0xff]  ;;  %1179 = vst [vmem:[%s1830_s21 + $0x5d0] sm:$0xff] %v923_v49  ;;  %v671_v59 = vld [vmem:[%s1815_s7 + $0x5f0] sm:$0xff]  ;;  %v672_v61 = vld [vmem:[%s1815_s7 + $0x5f8] sm:$0xff] }
  0xe9   : > { %v926_v58 = vadd.f32 %v670_v56, %v414_v55  ;;  %1180 = vst [vmem:[%s1830_s21 + $0x5d8] sm:$0xff] %v924_v53  ;;  %1181 = vst [vmem:[%s1830_s21 + $0x5e0] sm:$0xff] %v925_v54  ;;  %v927_v62 = vadd.f32 %v671_v59, %v415_v57  ;;  %v928_v63 = vadd.f32 %v672_v61, %v416_v60  ;;  %v417_v0 = vld [vmem:[%s1808_s5 + $0x600] sm:$0xff]  ;;  %v418_v2 = vld [vmem:[%s1808_s5 + $0x608] sm:$0xff] }
  0xea   : > { %v673_v1 = vld [vmem:[%s1815_s7 + $0x600] sm:$0xff]  ;;  %v674_v4 = vld [vmem:[%s1815_s7 + $0x608] sm:$0xff]  ;;  %v419_v5 = vld [vmem:[%s1808_s5 + $0x610] sm:$0xff] }
  0xeb   : > { %1182 = vst [vmem:[%s1830_s21 + $0x5e8] sm:$0xff] %v926_v58  ;;  %v929_v3 = vadd.f32 %v673_v1, %v417_v0  ;;  %v675_v6 = vld [vmem:[%s1815_s7 + $0x610] sm:$0xff]  ;;  %1183 = vst [vmem:[%s1830_s21 + $0x5f0] sm:$0xff] %v927_v62  ;;  %v930_v7 = vadd.f32 %v674_v4, %v418_v2  ;;  %v420_v9 = vld [vmem:[%s1808_s5 + $0x618] sm:$0xff] }
  0xec   : > { %1184 = vst [vmem:[%s1830_s21 + $0x5f8] sm:$0xff] %v928_v63  ;;  %v931_v8 = vadd.f32 %v675_v6, %v419_v5  ;;  %v676_v10 = vld [vmem:[%s1815_s7 + $0x618] sm:$0xff]  ;;  %v421_v11 = vld [vmem:[%s1808_s5 + $0x620] sm:$0xff]  ;;  %v422_v14 = vld [vmem:[%s1808_s5 + $0x628] sm:$0xff] }
  0xed   : > { %1185 = vst [vmem:[%s1830_s21 + $0x600] sm:$0xff] %v929_v3  ;;  %v932_v12 = vadd.f32 %v676_v10, %v420_v9  ;;  %v677_v13 = vld [vmem:[%s1815_s7 + $0x620] sm:$0xff]  ;;  %v678_v15 = vld [vmem:[%s1815_s7 + $0x628] sm:$0xff]  ;;  %1186 = vst [vmem:[%s1830_s21 + $0x608] sm:$0xff] %v930_v7 }
  0xee   : > { %1187 = vst [vmem:[%s1830_s21 + $0x610] sm:$0xff] %v931_v8  ;;  %v933_v16 = vadd.f32 %v677_v13, %v421_v11  ;;  %v934_v17 = vadd.f32 %v678_v15, %v422_v14  ;;  %v423_v18 = vld [vmem:[%s1808_s5 + $0x630] sm:$0xff]  ;;  %v424_v20 = vld [vmem:[%s1808_s5 + $0x638] sm:$0xff]  ;;  %v425_v23 = vld [vmem:[%s1808_s5 + $0x640] sm:$0xff] }
  0xef   : > { %v679_v19 = vld [vmem:[%s1815_s7 + $0x630] sm:$0xff]  ;;  %1188 = vst [vmem:[%s1830_s21 + $0x618] sm:$0xff] %v932_v12  ;;  %v680_v22 = vld [vmem:[%s1815_s7 + $0x638] sm:$0xff]  ;;  %v681_v24 = vld [vmem:[%s1815_s7 + $0x640] sm:$0xff] }
  0xf0   : > { %v935_v21 = vadd.f32 %v679_v19, %v423_v18  ;;  %1189 = vst [vmem:[%s1830_s21 + $0x620] sm:$0xff] %v933_v16  ;;  %1190 = vst [vmem:[%s1830_s21 + $0x628] sm:$0xff] %v934_v17  ;;  %v936_v25 = vadd.f32 %v680_v22, %v424_v20  ;;  %v937_v26 = vadd.f32 %v681_v24, %v425_v23  ;;  %v426_v27 = vld [vmem:[%s1808_s5 + $0x648] sm:$0xff]  ;;  %v427_v29 = vld [vmem:[%s1808_s5 + $0x650] sm:$0xff] }
  0xf1   : > { %v682_v28 = vld [vmem:[%s1815_s7 + $0x648] sm:$0xff]  ;;  %v683_v31 = vld [vmem:[%s1815_s7 + $0x650] sm:$0xff]  ;;  %v428_v32 = vld [vmem:[%s1808_s5 + $0x658] sm:$0xff] }
  0xf2   : > { %1191 = vst [vmem:[%s1830_s21 + $0x630] sm:$0xff] %v935_v21  ;;  %v938_v30 = vadd.f32 %v682_v28, %v426_v27  ;;  %v684_v33 = vld [vmem:[%s1815_s7 + $0x658] sm:$0xff]  ;;  %1192 = vst [vmem:[%s1830_s21 + $0x638] sm:$0xff] %v936_v25  ;;  %v939_v34 = vadd.f32 %v683_v31, %v427_v29  ;;  %v429_v36 = vld [vmem:[%s1808_s5 + $0x660] sm:$0xff] }
  0xf3   : > { %1193 = vst [vmem:[%s1830_s21 + $0x640] sm:$0xff] %v937_v26  ;;  %v940_v35 = vadd.f32 %v684_v33, %v428_v32  ;;  %v685_v37 = vld [vmem:[%s1815_s7 + $0x660] sm:$0xff]  ;;  %v430_v38 = vld [vmem:[%s1808_s5 + $0x668] sm:$0xff]  ;;  %v431_v41 = vld [vmem:[%s1808_s5 + $0x670] sm:$0xff] }
  0xf4   : > { %1194 = vst [vmem:[%s1830_s21 + $0x648] sm:$0xff] %v938_v30  ;;  %v941_v39 = vadd.f32 %v685_v37, %v429_v36  ;;  %v686_v40 = vld [vmem:[%s1815_s7 + $0x668] sm:$0xff]  ;;  %v687_v42 = vld [vmem:[%s1815_s7 + $0x670] sm:$0xff]  ;;  %1195 = vst [vmem:[%s1830_s21 + $0x650] sm:$0xff] %v939_v34 }
  0xf5   : > { %1196 = vst [vmem:[%s1830_s21 + $0x658] sm:$0xff] %v940_v35  ;;  %v942_v43 = vadd.f32 %v686_v40, %v430_v38  ;;  %v943_v44 = vadd.f32 %v687_v42, %v431_v41  ;;  %v432_v45 = vld [vmem:[%s1808_s5 + $0x678] sm:$0xff]  ;;  %v433_v47 = vld [vmem:[%s1808_s5 + $0x680] sm:$0xff]  ;;  %v434_v50 = vld [vmem:[%s1808_s5 + $0x688] sm:$0xff] }
  0xf6   : > { %v688_v46 = vld [vmem:[%s1815_s7 + $0x678] sm:$0xff]  ;;  %1197 = vst [vmem:[%s1830_s21 + $0x660] sm:$0xff] %v941_v39  ;;  %v689_v49 = vld [vmem:[%s1815_s7 + $0x680] sm:$0xff]  ;;  %v690_v51 = vld [vmem:[%s1815_s7 + $0x688] sm:$0xff] }
  0xf7   : > { %v944_v48 = vadd.f32 %v688_v46, %v432_v45  ;;  %1198 = vst [vmem:[%s1830_s21 + $0x668] sm:$0xff] %v942_v43  ;;  %1199 = vst [vmem:[%s1830_s21 + $0x670] sm:$0xff] %v943_v44  ;;  %v945_v52 = vadd.f32 %v689_v49, %v433_v47  ;;  %v946_v53 = vadd.f32 %v690_v51, %v434_v50  ;;  %v435_v54 = vld [vmem:[%s1808_s5 + $0x690] sm:$0xff]  ;;  %v436_v56 = vld [vmem:[%s1808_s5 + $0x698] sm:$0xff] }
  0xf8   : > { %v691_v55 = vld [vmem:[%s1815_s7 + $0x690] sm:$0xff]  ;;  %v692_v58 = vld [vmem:[%s1815_s7 + $0x698] sm:$0xff]  ;;  %v437_v59 = vld [vmem:[%s1808_s5 + $0x6a0] sm:$0xff] }
  0xf9   : > { %1200 = vst [vmem:[%s1830_s21 + $0x678] sm:$0xff] %v944_v48  ;;  %v947_v57 = vadd.f32 %v691_v55, %v435_v54  ;;  %v693_v60 = vld [vmem:[%s1815_s7 + $0x6a0] sm:$0xff]  ;;  %1201 = vst [vmem:[%s1830_s21 + $0x680] sm:$0xff] %v945_v52  ;;  %v948_v61 = vadd.f32 %v692_v58, %v436_v56  ;;  %v438_v63 = vld [vmem:[%s1808_s5 + $0x6a8] sm:$0xff] }
  0xfa   : > { %1202 = vst [vmem:[%s1830_s21 + $0x688] sm:$0xff] %v946_v53  ;;  %v949_v62 = vadd.f32 %v693_v60, %v437_v59  ;;  %v694_v0 = vld [vmem:[%s1815_s7 + $0x6a8] sm:$0xff]  ;;  %v439_v1 = vld [vmem:[%s1808_s5 + $0x6b0] sm:$0xff]  ;;  %v440_v4 = vld [vmem:[%s1808_s5 + $0x6b8] sm:$0xff] }
  0xfb   : > { %1203 = vst [vmem:[%s1830_s21 + $0x690] sm:$0xff] %v947_v57  ;;  %v950_v2 = vadd.f32 %v694_v0, %v438_v63  ;;  %v695_v3 = vld [vmem:[%s1815_s7 + $0x6b0] sm:$0xff]  ;;  %v696_v5 = vld [vmem:[%s1815_s7 + $0x6b8] sm:$0xff]  ;;  %1204 = vst [vmem:[%s1830_s21 + $0x698] sm:$0xff] %v948_v61 }
  0xfc   : > { %1205 = vst [vmem:[%s1830_s21 + $0x6a0] sm:$0xff] %v949_v62  ;;  %v951_v6 = vadd.f32 %v695_v3, %v439_v1  ;;  %v952_v7 = vadd.f32 %v696_v5, %v440_v4  ;;  %v441_v8 = vld [vmem:[%s1808_s5 + $0x6c0] sm:$0xff]  ;;  %v442_v10 = vld [vmem:[%s1808_s5 + $0x6c8] sm:$0xff]  ;;  %v443_v13 = vld [vmem:[%s1808_s5 + $0x6d0] sm:$0xff] }
  0xfd   : > { %v697_v9 = vld [vmem:[%s1815_s7 + $0x6c0] sm:$0xff]  ;;  %1206 = vst [vmem:[%s1830_s21 + $0x6a8] sm:$0xff] %v950_v2  ;;  %v698_v12 = vld [vmem:[%s1815_s7 + $0x6c8] sm:$0xff]  ;;  %v699_v14 = vld [vmem:[%s1815_s7 + $0x6d0] sm:$0xff] }
  0xfe   : > { %v953_v11 = vadd.f32 %v697_v9, %v441_v8  ;;  %1207 = vst [vmem:[%s1830_s21 + $0x6b0] sm:$0xff] %v951_v6  ;;  %1208 = vst [vmem:[%s1830_s21 + $0x6b8] sm:$0xff] %v952_v7  ;;  %v954_v15 = vadd.f32 %v698_v12, %v442_v10  ;;  %v955_v16 = vadd.f32 %v699_v14, %v443_v13  ;;  %v444_v17 = vld [vmem:[%s1808_s5 + $0x6d8] sm:$0xff]  ;;  %v445_v19 = vld [vmem:[%s1808_s5 + $0x6e0] sm:$0xff] }
  0xff   : > { %v700_v18 = vld [vmem:[%s1815_s7 + $0x6d8] sm:$0xff]  ;;  %v701_v21 = vld [vmem:[%s1815_s7 + $0x6e0] sm:$0xff]  ;;  %v446_v22 = vld [vmem:[%s1808_s5 + $0x6e8] sm:$0xff] }
 0x100   : > { %1209 = vst [vmem:[%s1830_s21 + $0x6c0] sm:$0xff] %v953_v11  ;;  %v956_v20 = vadd.f32 %v700_v18, %v444_v17  ;;  %v702_v23 = vld [vmem:[%s1815_s7 + $0x6e8] sm:$0xff]  ;;  %1210 = vst [vmem:[%s1830_s21 + $0x6c8] sm:$0xff] %v954_v15  ;;  %v957_v24 = vadd.f32 %v701_v21, %v445_v19  ;;  %v447_v26 = vld [vmem:[%s1808_s5 + $0x6f0] sm:$0xff] }
 0x101   : > { %1211 = vst [vmem:[%s1830_s21 + $0x6d0] sm:$0xff] %v955_v16  ;;  %v958_v25 = vadd.f32 %v702_v23, %v446_v22  ;;  %v703_v27 = vld [vmem:[%s1815_s7 + $0x6f0] sm:$0xff]  ;;  %v448_v28 = vld [vmem:[%s1808_s5 + $0x6f8] sm:$0xff]  ;;  %v449_v31 = vld [vmem:[%s1808_s5 + $0x700] sm:$0xff] }
 0x102   : > { %1212 = vst [vmem:[%s1830_s21 + $0x6d8] sm:$0xff] %v956_v20  ;;  %v959_v29 = vadd.f32 %v703_v27, %v447_v26  ;;  %v704_v30 = vld [vmem:[%s1815_s7 + $0x6f8] sm:$0xff]  ;;  %v705_v32 = vld [vmem:[%s1815_s7 + $0x700] sm:$0xff]  ;;  %1213 = vst [vmem:[%s1830_s21 + $0x6e0] sm:$0xff] %v957_v24 }
 0x103   : > { %1214 = vst [vmem:[%s1830_s21 + $0x6e8] sm:$0xff] %v958_v25  ;;  %v960_v33 = vadd.f32 %v704_v30, %v448_v28  ;;  %v961_v34 = vadd.f32 %v705_v32, %v449_v31  ;;  %v450_v35 = vld [vmem:[%s1808_s5 + $0x708] sm:$0xff]  ;;  %v451_v37 = vld [vmem:[%s1808_s5 + $0x710] sm:$0xff]  ;;  %v452_v40 = vld [vmem:[%s1808_s5 + $0x718] sm:$0xff] }
 0x104   : > { %v706_v36 = vld [vmem:[%s1815_s7 + $0x708] sm:$0xff]  ;;  %1215 = vst [vmem:[%s1830_s21 + $0x6f0] sm:$0xff] %v959_v29  ;;  %v707_v39 = vld [vmem:[%s1815_s7 + $0x710] sm:$0xff]  ;;  %v708_v41 = vld [vmem:[%s1815_s7 + $0x718] sm:$0xff] }
 0x105   : > { %v962_v38 = vadd.f32 %v706_v36, %v450_v35  ;;  %1216 = vst [vmem:[%s1830_s21 + $0x6f8] sm:$0xff] %v960_v33  ;;  %1217 = vst [vmem:[%s1830_s21 + $0x700] sm:$0xff] %v961_v34  ;;  %v963_v42 = vadd.f32 %v707_v39, %v451_v37  ;;  %v964_v43 = vadd.f32 %v708_v41, %v452_v40  ;;  %v453_v44 = vld [vmem:[%s1808_s5 + $0x720] sm:$0xff]  ;;  %v454_v46 = vld [vmem:[%s1808_s5 + $0x728] sm:$0xff] }
 0x106   : > { %v709_v45 = vld [vmem:[%s1815_s7 + $0x720] sm:$0xff]  ;;  %v710_v48 = vld [vmem:[%s1815_s7 + $0x728] sm:$0xff]  ;;  %v455_v49 = vld [vmem:[%s1808_s5 + $0x730] sm:$0xff] }
 0x107   : > { %1218 = vst [vmem:[%s1830_s21 + $0x708] sm:$0xff] %v962_v38  ;;  %v965_v47 = vadd.f32 %v709_v45, %v453_v44  ;;  %v711_v50 = vld [vmem:[%s1815_s7 + $0x730] sm:$0xff]  ;;  %1219 = vst [vmem:[%s1830_s21 + $0x710] sm:$0xff] %v963_v42  ;;  %v966_v51 = vadd.f32 %v710_v48, %v454_v46  ;;  %v456_v53 = vld [vmem:[%s1808_s5 + $0x738] sm:$0xff] }
 0x108   : > { %1220 = vst [vmem:[%s1830_s21 + $0x718] sm:$0xff] %v964_v43  ;;  %v967_v52 = vadd.f32 %v711_v50, %v455_v49  ;;  %v712_v54 = vld [vmem:[%s1815_s7 + $0x738] sm:$0xff]  ;;  %v457_v55 = vld [vmem:[%s1808_s5 + $0x740] sm:$0xff]  ;;  %v458_v58 = vld [vmem:[%s1808_s5 + $0x748] sm:$0xff] }
 0x109   : > { %1221 = vst [vmem:[%s1830_s21 + $0x720] sm:$0xff] %v965_v47  ;;  %v968_v56 = vadd.f32 %v712_v54, %v456_v53  ;;  %v713_v57 = vld [vmem:[%s1815_s7 + $0x740] sm:$0xff]  ;;  %v714_v59 = vld [vmem:[%s1815_s7 + $0x748] sm:$0xff]  ;;  %1222 = vst [vmem:[%s1830_s21 + $0x728] sm:$0xff] %v966_v51 }
 0x10a   : > { %1223 = vst [vmem:[%s1830_s21 + $0x730] sm:$0xff] %v967_v52  ;;  %v969_v60 = vadd.f32 %v713_v57, %v457_v55  ;;  %v970_v61 = vadd.f32 %v714_v59, %v458_v58  ;;  %v459_v62 = vld [vmem:[%s1808_s5 + $0x750] sm:$0xff]  ;;  %v460_v0 = vld [vmem:[%s1808_s5 + $0x758] sm:$0xff]  ;;  %v461_v3 = vld [vmem:[%s1808_s5 + $0x760] sm:$0xff] }
 0x10b   : > { %v715_v63 = vld [vmem:[%s1815_s7 + $0x750] sm:$0xff]  ;;  %1224 = vst [vmem:[%s1830_s21 + $0x738] sm:$0xff] %v968_v56  ;;  %v716_v2 = vld [vmem:[%s1815_s7 + $0x758] sm:$0xff]  ;;  %v717_v4 = vld [vmem:[%s1815_s7 + $0x760] sm:$0xff] }
 0x10c   : > { %v971_v1 = vadd.f32 %v715_v63, %v459_v62  ;;  %1225 = vst [vmem:[%s1830_s21 + $0x740] sm:$0xff] %v969_v60  ;;  %1226 = vst [vmem:[%s1830_s21 + $0x748] sm:$0xff] %v970_v61  ;;  %v972_v5 = vadd.f32 %v716_v2, %v460_v0  ;;  %v973_v6 = vadd.f32 %v717_v4, %v461_v3  ;;  %v462_v7 = vld [vmem:[%s1808_s5 + $0x768] sm:$0xff]  ;;  %v463_v9 = vld [vmem:[%s1808_s5 + $0x770] sm:$0xff] }
 0x10d   : > { %v718_v8 = vld [vmem:[%s1815_s7 + $0x768] sm:$0xff]  ;;  %v719_v11 = vld [vmem:[%s1815_s7 + $0x770] sm:$0xff]  ;;  %v464_v12 = vld [vmem:[%s1808_s5 + $0x778] sm:$0xff] }
 0x10e   : > { %1227 = vst [vmem:[%s1830_s21 + $0x750] sm:$0xff] %v971_v1  ;;  %v974_v10 = vadd.f32 %v718_v8, %v462_v7  ;;  %v720_v13 = vld [vmem:[%s1815_s7 + $0x778] sm:$0xff]  ;;  %1228 = vst [vmem:[%s1830_s21 + $0x758] sm:$0xff] %v972_v5  ;;  %v975_v14 = vadd.f32 %v719_v11, %v463_v9  ;;  %v465_v16 = vld [vmem:[%s1808_s5 + $0x780] sm:$0xff] }
 0x10f   : > { %1229 = vst [vmem:[%s1830_s21 + $0x760] sm:$0xff] %v973_v6  ;;  %v976_v15 = vadd.f32 %v720_v13, %v464_v12  ;;  %v721_v17 = vld [vmem:[%s1815_s7 + $0x780] sm:$0xff]  ;;  %v466_v18 = vld [vmem:[%s1808_s5 + $0x788] sm:$0xff]  ;;  %v467_v21 = vld [vmem:[%s1808_s5 + $0x790] sm:$0xff] }
 0x110   : > { %1230 = vst [vmem:[%s1830_s21 + $0x768] sm:$0xff] %v974_v10  ;;  %v977_v19 = vadd.f32 %v721_v17, %v465_v16  ;;  %v722_v20 = vld [vmem:[%s1815_s7 + $0x788] sm:$0xff]  ;;  %v723_v22 = vld [vmem:[%s1815_s7 + $0x790] sm:$0xff]  ;;  %1231 = vst [vmem:[%s1830_s21 + $0x770] sm:$0xff] %v975_v14 }
 0x111   : > { %1232 = vst [vmem:[%s1830_s21 + $0x778] sm:$0xff] %v976_v15  ;;  %v978_v23 = vadd.f32 %v722_v20, %v466_v18  ;;  %v979_v24 = vadd.f32 %v723_v22, %v467_v21  ;;  %v468_v25 = vld [vmem:[%s1808_s5 + $0x798] sm:$0xff]  ;;  %v469_v27 = vld [vmem:[%s1808_s5 + $0x7a0] sm:$0xff]  ;;  %v470_v30 = vld [vmem:[%s1808_s5 + $0x7a8] sm:$0xff] }
 0x112   : > { %v724_v26 = vld [vmem:[%s1815_s7 + $0x798] sm:$0xff]  ;;  %1233 = vst [vmem:[%s1830_s21 + $0x780] sm:$0xff] %v977_v19  ;;  %v725_v29 = vld [vmem:[%s1815_s7 + $0x7a0] sm:$0xff]  ;;  %v726_v31 = vld [vmem:[%s1815_s7 + $0x7a8] sm:$0xff] }
 0x113   : > { %v980_v28 = vadd.f32 %v724_v26, %v468_v25  ;;  %1234 = vst [vmem:[%s1830_s21 + $0x788] sm:$0xff] %v978_v23  ;;  %1235 = vst [vmem:[%s1830_s21 + $0x790] sm:$0xff] %v979_v24  ;;  %v981_v32 = vadd.f32 %v725_v29, %v469_v27  ;;  %v982_v33 = vadd.f32 %v726_v31, %v470_v30  ;;  %v471_v34 = vld [vmem:[%s1808_s5 + $0x7b0] sm:$0xff]  ;;  %v472_v36 = vld [vmem:[%s1808_s5 + $0x7b8] sm:$0xff] }
 0x114   : > { %v727_v35 = vld [vmem:[%s1815_s7 + $0x7b0] sm:$0xff]  ;;  %v728_v38 = vld [vmem:[%s1815_s7 + $0x7b8] sm:$0xff]  ;;  %v473_v39 = vld [vmem:[%s1808_s5 + $0x7c0] sm:$0xff] }
 0x115   : > { %1236 = vst [vmem:[%s1830_s21 + $0x798] sm:$0xff] %v980_v28  ;;  %v983_v37 = vadd.f32 %v727_v35, %v471_v34  ;;  %v729_v40 = vld [vmem:[%s1815_s7 + $0x7c0] sm:$0xff]  ;;  %1237 = vst [vmem:[%s1830_s21 + $0x7a0] sm:$0xff] %v981_v32  ;;  %v984_v41 = vadd.f32 %v728_v38, %v472_v36  ;;  %v474_v43 = vld [vmem:[%s1808_s5 + $0x7c8] sm:$0xff] }
 0x116   : > { %1238 = vst [vmem:[%s1830_s21 + $0x7a8] sm:$0xff] %v982_v33  ;;  %v985_v42 = vadd.f32 %v729_v40, %v473_v39  ;;  %v730_v44 = vld [vmem:[%s1815_s7 + $0x7c8] sm:$0xff]  ;;  %v475_v45 = vld [vmem:[%s1808_s5 + $0x7d0] sm:$0xff]  ;;  %v476_v48 = vld [vmem:[%s1808_s5 + $0x7d8] sm:$0xff] }
 0x117   : > { %1239 = vst [vmem:[%s1830_s21 + $0x7b0] sm:$0xff] %v983_v37  ;;  %v986_v46 = vadd.f32 %v730_v44, %v474_v43  ;;  %v731_v47 = vld [vmem:[%s1815_s7 + $0x7d0] sm:$0xff]  ;;  %v732_v49 = vld [vmem:[%s1815_s7 + $0x7d8] sm:$0xff]  ;;  %1240 = vst [vmem:[%s1830_s21 + $0x7b8] sm:$0xff] %v984_v41 }
 0x118   : > { %1241 = vst [vmem:[%s1830_s21 + $0x7c0] sm:$0xff] %v985_v42  ;;  %v987_v50 = vadd.f32 %v731_v47, %v475_v45  ;;  %v988_v51 = vadd.f32 %v732_v49, %v476_v48  ;;  %v477_v52 = vld [vmem:[%s1808_s5 + $0x7e0] sm:$0xff]  ;;  %v478_v54 = vld [vmem:[%s1808_s5 + $0x7e8] sm:$0xff]  ;;  %v479_v57 = vld [vmem:[%s1808_s5 + $0x7f0] sm:$0xff] }
 0x119   : > { %v733_v53 = vld [vmem:[%s1815_s7 + $0x7e0] sm:$0xff]  ;;  %1242 = vst [vmem:[%s1830_s21 + $0x7c8] sm:$0xff] %v986_v46  ;;  %v734_v56 = vld [vmem:[%s1815_s7 + $0x7e8] sm:$0xff]  ;;  %v735_v58 = vld [vmem:[%s1815_s7 + $0x7f0] sm:$0xff] }
 0x11a   : > { %v989_v55 = vadd.f32 %v733_v53, %v477_v52  ;;  %1243 = vst [vmem:[%s1830_s21 + $0x7d0] sm:$0xff] %v987_v50  ;;  %1244 = vst [vmem:[%s1830_s21 + $0x7d8] sm:$0xff] %v988_v51  ;;  %v990_v59 = vadd.f32 %v734_v56, %v478_v54  ;;  %v991_v60 = vadd.f32 %v735_v58, %v479_v57  ;;  %v480_v61 = vld [vmem:[%s1808_s5 + $0x7f8] sm:$0xff] }
 0x11b   : > { %v736_v62 = vld [vmem:[%s1815_s7 + $0x7f8] sm:$0xff] }
 0x11c   : > { %1245 = vst [vmem:[%s1830_s21 + $0x7e0] sm:$0xff] %v989_v55  ;;  %v992_v63 = vadd.f32 %v736_v62, %v480_v61  ;;  %1246 = vst [vmem:[%s1830_s21 + $0x7e8] sm:$0xff] %v990_v59 }
 0x11d   : > { %1247 = vst [vmem:[%s1830_s21 + $0x7f0] sm:$0xff] %v991_v60 }
 0x11e   : > { %1248 = vst [vmem:[%s1830_s21 + $0x7f8] sm:$0xff] %v992_v63 }
 0x11f   : > { %1540 = shalt.err (!%p1537_p11)
}
 0x120   : > { %s1541_s20 = scalar_lea.hbm %s2592_s28, 32768  ;;  %s1545_s29 = scalar_lea.hbm %s2648_s2, 131072 }
 0x121   : > { %p1542_p5 = scmp.ne.s32.totalorder %s2592_s28, %s1541_s20  ;;  %p1546_p3 = scmp.lt.u32.totalorder %s2592_s28, %s2648_s2 }
 0x122   : > { %p1547_p4 = scmp.lt.u32.totalorder %s1545_s29, %s1541_s20  ;;  %p1549_p13 = scmp.lt.u32.totalorder %s1541_s20, %s2592_s28 }
 0x123   : > { %p1543_p10 = pnand %p1542_p5, %p2659_p2 }
 0x124   : > { %p1548_p8 = por %p1547_p4, %p1546_p3 }
 0x125   : > { %p1544_p1 = pneg %p1543_p10 }
 0x126   : > { %p1550_p0 = por %p1549_p13, %p1548_p8 }
 0x128   : > { %p1551_p12 = pnand %p1550_p0, %p1544_p1 }
 0x12a   : > { %1554 = shalt.err (!%p1551_p12)
}
 0x12b   : > { %s1620_s7 = smov 128   ;;  %s1621_s21 = smov 8  }
 0x12c   : > { %1400 = dma.vmem_to_hbm [thread:$0]  (%p2659_p2), %s2594_s18, 32768, %s2592_s28, %s1250_s30, %s1620_s7, %s1620_s7, %s1621_s21  }
 0x12d PF: > { %p1414_p6 = scmp.ge.s32.totalorder %s1613_s14, 2  ;;  %s1279_s8 = sand.u32 1, %s1593_s9  }
 0x12e   : > { %p2660_p7 = scmp.ne.s32.totalorder %s2654_s24, 0  ;;  %s1280_s12 = scalar_lea.sflag [#allocation4], %s1279_s8 }
 0x130   : > { %p1410_p9 = pnand %p1414_p6, %p2660_p7 }
 0x132   : > { %1588 = dma.done.wait (!%p1410_p9), %s1280_s12, 32768  }
 0x133   : > { %1590 = vsyncadd (!%p1410_p9), %s1280_s12, 4294934528  ;;  %s21_s14 = sadd.s32 1, %s1613_s14   ;;  %s2661_s9 = smov %s1597_s10 }
 0x134   : > { %p18_p11 = scmp.ge.s32.totalorder %s21_s14, 6   ;;  %s2662_s10 = smov %s1601_s11 }
 0x135   : > { %s2663_s11 = smov %s1693_s23  ;;  %s2664_s12 = smov %s1609_s13 }
 0x136   : > { %s2665_s13 = smov %s2667_s17  ;;  %20 = sbr.rel (!%p18_p11) target bundleno = 8 (0x8), region = 86 }
 0x13d   :  { %1285 = vsyncpa [#allocation3], 1 }
 0x13e   :  { %1287 = vsyncpa [#allocation3 + $0x1], 1 }
 0x13f   :  { %1288 = vsyncpa [#allocation6], 1 }
 0x140   :  { %1290 = vsyncpa [#allocation6 + $0x1], 1 }
 0x141   :  { %1291 = vsyncpa [#allocation4], 1 }
 0x142   :  { %1293 = vsyncpa [#allocation4 + $0x1], 1 }

</bundles_post_ra>
